<compile_context>
chip_gen: v5e
topology: v5e:2x2
jax: 0.10.0
libtpu: 0.0.40
codegen_flags: <defaults>
</compile_context>

<pallas_src>
import functools

import jax
import jax.numpy as jnp
import numpy as np
from jax.experimental import pallas as pl
from jax.experimental.pallas import tpu as pltpu


# Source taps (a, b) of the padded ORIGINAL image, grouped by how many output
# phases p = 2*dy + dx share them; per tap, the tuple lists the phases in the
# order their (C, C) weight blocks are stacked along N.
_TAPS_1 = ((0, 0, (0,)), (0, 2, (1,)), (2, 0, (2,)), (2, 2, (3,)))       # corners
_TAPS_2 = ((0, 1, (0, 1)), (1, 0, (0, 2)), (1, 2, (1, 3)), (2, 1, (2, 3)))  # edges
_TAP_4 = (1, 1, (0, 1, 2, 3))                                            # center


def _upsample_conv_kernel(xa_ref, xb_ref, w1_ref, w2_ref, w4_ref, b_ref, o_ref):
    """One (batch, row-tile) step of the fused 2x-upsample + 3x3 conv.

    xa_ref: (1, TH, Wp, Cp)  bf16  padded-input rows [t*TH, t*TH + TH)
    xb_ref: (1, 2,  Wp, Cp)  bf16  2-row halo:        [(t+1)*TH, (t+1)*TH + 2)
    w1_ref: (4, Cp, Cp)      bf16  corner-tap weights (1 phase each)
    w2_ref: (4, Cp, 2*Cp)    bf16  edge-tap weights   (2 phases stacked on N)
    w4_ref: (Cp, 4*Cp)       bf16  center-tap weights (4 phases stacked on N)
    b_ref : (1, Cp)          f32   bias
    o_ref : (1, 4, TH, Wc, Cp) bf16  per-phase conv output
    """
    _, _, TH, Wc, Cp = o_ref.shape

    # Full (TH+2)-row halo window, then the three column-shifted views reused by
    # every tap.  Wc is a multiple of 8 and Cp a multiple of 128, so the
    # reshape below is a free re-view (no relayout).
    win = jnp.concatenate([xa_ref[0], xb_ref[0]], axis=0)        # (TH+2, Wp, Cp)
    cols = [win[:, b:b + Wc, :] for b in range(3)]               # 3 x (TH+2, Wc, Cp)

    def lhs(a, b):
        return cols[b][a:a + TH].reshape(TH * Wc, Cp)            # (M, Cp), free view

    # Bias folded into the accumulator init (saves an epilogue VPU pass).
    bias = jnp.broadcast_to(b_ref[...], (TH * Wc, Cp))           # f32
    acc = [bias, bias, bias, bias]

    # Center tap: one (M, Cp) x (Cp, 4Cp) matmul feeding all four phases.
    a, b, phases = _TAP_4
    r = jnp.dot(lhs(a, b), w4_ref[...], preferred_element_type=jnp.float32)
    for s, p in enumerate(phases):
        acc[p] = acc[p] + r[:, s * Cp:(s + 1) * Cp]

    # Edge taps: (M, Cp) x (Cp, 2Cp), two phases each.
    for i, (a, b, phases) in enumerate(_TAPS_2):
        r = jnp.dot(lhs(a, b), w2_ref[i], preferred_element_type=jnp.float32)
        for s, p in enumerate(phases):
            acc[p] = acc[p] + r[:, s * Cp:(s + 1) * Cp]

    # Corner taps: (M, Cp) x (Cp, Cp), single phase.
    for i, (a, b, phases) in enumerate(_TAPS_1):
        r = jnp.dot(lhs(a, b), w1_ref[i], preferred_element_type=jnp.float32)
        acc[phases[0]] = acc[phases[0]] + r

    for p in range(4):
        o_ref[0, p] = acc[p].reshape(TH, Wc, Cp).astype(o_ref.dtype)


def _tpu_vmem_limit_bytes():
    """~75% of physical VMEM: ~96 MiB on v5e/v6e (128 MiB), ~48 MiB on v7x (64 MiB)."""
    phys = 128 << 20
    try:
        v = int(pltpu.get_tpu_info().vmem_capacity_bytes)
        if v >= (16 << 20):
            phys = v
    except Exception:
        pass
    return max(32 << 20, phys * 3 // 4)


def _step_vmem_bytes(th, Wc, Wp, Cp):
    """Rough per-grid-step VMEM footprint (double-buffered IO blocks + temporaries)."""
    a_blk = th * Wp * Cp * 2            # bf16 main input block
    h_blk = 2 * Wp * Cp * 2             # bf16 halo block
    o_blk = 4 * th * Wc * Cp * 2        # bf16 output block
    w_all = 16 * Cp * Cp * 2 + Cp * 4   # folded weights (bf16) + bias (f32)
    win = (th + 2) * Wp * Cp * 2        # concatenated halo window
    cols = 3 * (th + 2) * Wc * Cp * 2   # column-shifted views
    accs = 4 * th * Wc * Cp * 4         # f32 accumulators
    r_max = th * Wc * 4 * Cp * 4        # largest (center-tap) matmul result
    return 2 * (a_blk + h_blk + o_blk) + 2 * w_all + win + cols + accs + r_max


def _pick_tile_h(B, H, Wc, Wp, Cp, vmem_limit, min_steps=4):
    """Largest even divisor of H whose per-step footprint fits the VMEM budget,
    while keeping at least `min_steps` grid steps (pipelining + v7x megacore)."""
    budget = int(vmem_limit * 0.7)
    divs = [th for th in range(2, H + 1, 2)
            if H % th == 0 and _step_vmem_bytes(th, Wc, Wp, Cp) <= budget]
    if not divs:
        return 2
    ok = [th for th in divs if B * (H // th) >= min_steps]
    return max(ok) if ok else min(divs)


def upsample_forward(x, weight, bias, *, tile_h=None):
    """Fused 2x nearest-neighbour upsample + 3x3 'same' conv.

    x: (B, C, H, W) NCHW; weight: (C, C, 3, 3) OIHW; bias: (C,).
    Returns (B, C, 2H, 2W) NCHW with x.dtype.
    """
    B, C, H, W = x.shape
    if H % 2 != 0:
        # TODO(synk): odd H needs a 1-row halo-spec variant; codec shapes are even.
        raise NotImplementedError("upsample_forward requires even H")

    Cp = 128 if C < 128 else C          # lane-dense stores / full MXU rows for tiny C
    # TODO(synk): C >= 128 but not a multiple of 128 keeps masked lanes; rare in practice.
    Wc = ((W + 7) // 8) * 8             # compute width: multiple of 8 -> free reshapes
    Wp = ((Wc + 2 + 7) // 8) * 8        # padded input width (>= Wc + 2 for 3 column shifts)

    vmem_limit = _tpu_vmem_limit_bytes()
    TH = tile_h if tile_h is not None else _pick_tile_h(B, H, Wc, Wp, Cp, vmem_limit)
    if TH <= 0 or H % TH != 0 or TH % 2 != 0:
        raise ValueError(f"invalid row tile {TH} for H={H}")
    NT = H // TH

    # ---- glue: NCHW->NHWC + pad + cast (original-size image, no 4x blow-up) ----
    x_nhwc = jnp.transpose(x, (0, 2, 3, 1)).astype(jnp.bfloat16)                # (B,H,W,C)
    xpad = jnp.pad(x_nhwc, ((0, 0), (1, 1), (1, Wp - W - 1), (0, Cp - C)))      # (B,H+2,Wp,Cp)

    # ---- fold the nearest-2x upsample into the conv weights ----
    # M[d, r, k] = 1 iff original 3x3 tap k contributes to folded 2x2 tap r for
    # output-phase offset d.
    M = jnp.array([[[1., 0., 0.], [0., 1., 1.]],
                   [[1., 1., 0.], [0., 0., 1.]]], dtype=jnp.float32)
    w_hwio = jnp.transpose(weight, (2, 3, 1, 0)).astype(jnp.float32)            # (3,3,Ci,Co)
    if Cp != C:
        w_hwio = jnp.pad(w_hwio, ((0, 0), (0, 0), (0, Cp - C), (0, Cp - C)))
    w_fold = jnp.einsum('yrh,xsw,hwio->yxrsio', M, M, w_hwio)      # (2,2,2,2,Cp,Cp)

    def tap_weight(a, b, phases):
        # stack the participating phases' (Cp, Cp) blocks along N (lanes)
        blocks = [w_fold[p // 2, p % 2, a - p // 2, b - p % 2] for p in phases]
        return jnp.concatenate(blocks, axis=1)

    w1 = jnp.stack([tap_weight(a, b, ph) for a, b, ph in _TAPS_1]).astype(jnp.bfloat16)
    w2 = jnp.stack([tap_weight(a, b, ph) for a, b, ph in _TAPS_2]).astype(jnp.bfloat16)
    a4, b4, ph4 = _TAP_4
    w4 = tap_weight(a4, b4, ph4).astype(jnp.bfloat16)
    b2 = jnp.pad(bias.astype(jnp.float32), (0, Cp - C)).reshape(1, Cp)

    est = _step_vmem_bytes(TH, Wc, Wp, Cp)
    vmem_bytes = int(min(vmem_limit, max(32 << 20, est + (8 << 20))))

    out = pl.pallas_call(
        _upsample_conv_kernel,
        out_shape=jax.ShapeDtypeStruct((B, 4, H, Wc, Cp), jnp.bfloat16),
        grid_spec=pltpu.PrefetchScalarGridSpec(
            num_scalar_prefetch=0,
            grid=(B, NT),
            in_specs=[
                # main row tile of the padded input: rows [t*TH, t*TH + TH)
                pl.BlockSpec((1, TH, Wp, Cp), lambda b, t: (b, t, 0, 0)),
                # 2-row halo below the tile: rows [(t+1)*TH, (t+1)*TH + 2).
                # NOTE: this is a *block* index for a 2-row block, hence the
                # (t+1)*(TH//2); correct only because the halo block is exactly
                # 2 rows tall and TH is even (checked above).
                pl.BlockSpec((1, 2, Wp, Cp),
                             lambda b, t: (b, (t + 1) * (TH // 2), 0, 0)),
                # grid-invariant folded weights + bias (resident in VMEM)
                # TODO(synk): pipeline_mode=pl.Buffered(1) here would halve the
                # weight VMEM footprint on v7x; left default-buffered for safety.
                pl.BlockSpec((4, Cp, Cp), lambda b, t: (0, 0, 0)),
                pl.BlockSpec((4, Cp, 2 * Cp), lambda b, t: (0, 0, 0)),
                pl.BlockSpec((Cp, 4 * Cp), lambda b, t: (0, 0)),
                pl.BlockSpec((1, Cp), lambda b, t: (0, 0)),
            ],
            out_specs=pl.BlockSpec((1, 4, TH, Wc, Cp), lambda b, t: (b, 0, t, 0, 0)),
        ),
        compiler_params=pltpu.CompilerParams(
            dimension_semantics=("parallel", "parallel"),
            vmem_limit_bytes=vmem_bytes),
    )(xpad, xpad, w1, w2, w4, b2)

    # (B, 4=2*dy+dx, H, Wc, Cp) -> (B, C, 2H, 2W): drop the channel/width
    # padding, interleave the phases and go NHWC->NCHW in one fused XLA copy.
    y = out[:, :, :, :W, :C].reshape(B, 2, 2, H, W, C)
    y = y.transpose(0, 5, 3, 1, 4, 2).reshape(B, C, 2 * H, 2 * W)
    return y.astype(x.dtype)


def init_params(key, channels):
    """Deterministic init matching nn.Conv2d defaults (kaiming-uniform, a=sqrt(5))."""
    kw, kb = jax.random.split(key)
    fan_in = channels * 3 * 3
    bound = 1.0 / np.sqrt(fan_in)
    weight = jax.random.uniform(kw, (channels, channels, 3, 3),
                                minval=-bound, maxval=bound, dtype=jnp.float32)
    bias = jax.random.uniform(kb, (channels,),
                              minval=-bound, maxval=bound, dtype=jnp.float32)
    return weight, bias


if __name__ == "__main__":
    B, C, H, W = 2, 4, 16, 16
    key = jax.random.PRNGKey(0)
    kx, kp = jax.random.split(key)
    x = jax.random.normal(kx, (B, C, H, W), dtype=jnp.float32)
    weight, bias = init_params(kp, C)

    # reference: plain-JAX nearest upsample + conv (NCHW / OIHW, padding 1), f32
    xu_ref = jnp.repeat(jnp.repeat(x, 2, axis=2), 2, axis=3)
    ref = jax.lax.conv_general_dilated(
        xu_ref, weight, window_strides=(1, 1), padding=((1, 1), (1, 1)),
        dimension_numbers=("NCHW", "OIHW", "NCHW")) + bias.reshape(1, C, 1, 1)

    # explicit small row tile (exercises the 2-row halo path across 4 tiles) ...
    fwd_tiled = jax.jit(functools.partial(upsample_forward, tile_h=4))
    out = jax.block_until_ready(fwd_tiled(x, weight, bias))
    assert out.shape == (B, C, 2 * H, 2 * W), out.shape
    np.testing.assert_allclose(np.asarray(out), np.asarray(ref),
                               rtol=2e-2, atol=2e-2)

    # ... and the auto-picked tile (TH=8 here: keeps >=4 grid steps for
    # pipelining / megacore while staying inside the per-generation VMEM budget).
    out2 = jax.block_until_ready(jax.jit(upsample_forward)(x, weight, bias))
    np.testing.assert_allclose(np.asarray(out2), np.asarray(ref),
                               rtol=2e-2, atol=2e-2)

    print("KERNEL_OK")
</pallas_src>

<mosaic_0001>
module attributes {stable_mosaic.version = 11 : i64} {
  func.func @_upsample_conv_kernel(%arg0: i32, %arg1: i32, %arg2: memref<1x4x24x128xbf16, #tpu.memory_space<vmem>>, %arg3: memref<1x2x24x128xbf16, #tpu.memory_space<vmem>>, %arg4: memref<4x128x128xbf16, #tpu.memory_space<vmem>>, %arg5: memref<4x128x256xbf16, #tpu.memory_space<vmem>>, %arg6: memref<128x512xbf16, #tpu.memory_space<vmem>>, %arg7: memref<1x128xf32, #tpu.memory_space<vmem>>, %arg8: memref<1x4x4x16x128xbf16, #tpu.memory_space<vmem>>) attributes {dimension_semantics = [#tpu.dimension_semantics<parallel>, #tpu.dimension_semantics<parallel>], iteration_bounds = array<i64: 2, 4>, scalar_prefetch = 0 : i64, scratch_operands = 0 : i64, tpu.core_type = #tpu.core_type<tc>, window_params = [{transform_indices = @transform_0, window_bounds = array<i64: 1, 4, 24, 128>}, {transform_indices = @transform_1, window_bounds = array<i64: 1, 2, 24, 128>}, {pipeline_mode = #tpu.pipeline_mode<synchronous>, transform_indices = @transform_2, window_bounds = array<i64: 4, 128, 128>}, {pipeline_mode = #tpu.pipeline_mode<synchronous>, transform_indices = @transform_3, window_bounds = array<i64: 4, 128, 256>}, {pipeline_mode = #tpu.pipeline_mode<synchronous>, transform_indices = @transform_4, window_bounds = array<i64: 128, 512>}, {pipeline_mode = #tpu.pipeline_mode<synchronous>, transform_indices = @transform_5, window_bounds = array<i64: 1, 128>}, {transform_indices = @transform_6, window_bounds = array<i64: 1, 4, 4, 16, 128>}]} {
    %c0 = arith.constant 0 : index
    %c0_0 = arith.constant 0 : index
    %c0_1 = arith.constant 0 : index
    %c0_2 = arith.constant 0 : index
    %0 = vector.load %arg2[%c0, %c0_0, %c0_1, %c0_2] : memref<1x4x24x128xbf16, #tpu.memory_space<vmem>>, vector<1x4x24x128xbf16>
    %1 = vector.shape_cast %0 : vector<1x4x24x128xbf16> to vector<4x24x128xbf16>
    %c0_3 = arith.constant 0 : index
    %c0_4 = arith.constant 0 : index
    %c0_5 = arith.constant 0 : index
    %c0_6 = arith.constant 0 : index
    %2 = vector.load %arg3[%c0_3, %c0_4, %c0_5, %c0_6] : memref<1x2x24x128xbf16, #tpu.memory_space<vmem>>, vector<1x2x24x128xbf16>
    %3 = vector.shape_cast %2 : vector<1x2x24x128xbf16> to vector<2x24x128xbf16>
    %4 = tpu.concatenate %1, %3 in 0 : vector<4x24x128xbf16>, vector<2x24x128xbf16> -> vector<6x24x128xbf16>
    %5 = vector.extract_strided_slice %4 {offsets = [0, 0, 0], sizes = [6, 16, 128], strides = [1, 1, 1]} : vector<6x24x128xbf16> to vector<6x16x128xbf16>
    %6 = vector.extract_strided_slice %4 {offsets = [0, 1, 0], sizes = [6, 16, 128], strides = [1, 1, 1]} : vector<6x24x128xbf16> to vector<6x16x128xbf16>
    %7 = vector.extract_strided_slice %4 {offsets = [0, 2, 0], sizes = [6, 16, 128], strides = [1, 1, 1]} : vector<6x24x128xbf16> to vector<6x16x128xbf16>
    %c0_7 = arith.constant 0 : index
    %c0_8 = arith.constant 0 : index
    %8 = vector.load %arg7[%c0_7, %c0_8] : memref<1x128xf32, #tpu.memory_space<vmem>>, vector<1x128xf32>
    %9 = vector.shape_cast %8 : vector<1x128xf32> to vector<1x128xf32>
    %10 = vector.broadcast %9 : vector<1x128xf32> to vector<64x128xf32>
    %11 = vector.extract_strided_slice %6 {offsets = [1, 0, 0], sizes = [4, 16, 128], strides = [1, 1, 1]} : vector<6x16x128xbf16> to vector<4x16x128xbf16>
    %12 = vector.shape_cast %11 : vector<4x16x128xbf16> to vector<64x128xbf16>
    %c0_9 = arith.constant 0 : index
    %c0_10 = arith.constant 0 : index
    %13 = vector.load %arg6[%c0_9, %c0_10] : memref<128x512xbf16, #tpu.memory_space<vmem>>, vector<128x512xbf16>
    %cst = arith.constant dense<0.000000e+00> : vector<64x512xf32>
    %14 = tpu.matmul %12, %13, %cst {dimension_numbers = #tpu.dot_dimension_numbers<[1], [0], [0], [1], [0, 0, 1, 1], [], []>} : vector<64x128xbf16>, vector<128x512xbf16>, vector<64x512xf32> -> vector<64x512xf32>
    %15 = vector.extract_strided_slice %14 {offsets = [0, 0], sizes = [64, 128], strides = [1, 1]} : vector<64x512xf32> to vector<64x128xf32>
    %16 = arith.addf %10, %15 : vector<64x128xf32>
    %17 = vector.extract_strided_slice %14 {offsets = [0, 128], sizes = [64, 128], strides = [1, 1]} : vector<64x512xf32> to vector<64x128xf32>
    %18 = arith.addf %10, %17 : vector<64x128xf32>
    %19 = vector.extract_strided_slice %14 {offsets = [0, 256], sizes = [64, 128], strides = [1, 1]} : vector<64x512xf32> to vector<64x128xf32>
    %20 = arith.addf %10, %19 : vector<64x128xf32>
    %21 = vector.extract_strided_slice %14 {offsets = [0, 384], sizes = [64, 128], strides = [1, 1]} : vector<64x512xf32> to vector<64x128xf32>
    %22 = arith.addf %10, %21 : vector<64x128xf32>
    %23 = vector.extract_strided_slice %6 {offsets = [0, 0, 0], sizes = [4, 16, 128], strides = [1, 1, 1]} : vector<6x16x128xbf16> to vector<4x16x128xbf16>
    %24 = vector.shape_cast %23 : vector<4x16x128xbf16> to vector<64x128xbf16>
    %c0_11 = arith.constant 0 : index
    %c0_12 = arith.constant 0 : index
    %c0_13 = arith.constant 0 : index
    %25 = vector.load %arg5[%c0_11, %c0_12, %c0_13] : memref<4x128x256xbf16, #tpu.memory_space<vmem>>, vector<1x128x256xbf16>
    %26 = vector.shape_cast %25 : vector<1x128x256xbf16> to vector<128x256xbf16>
    %cst_14 = arith.constant dense<0.000000e+00> : vector<64x256xf32>
    %27 = tpu.matmul %24, %26, %cst_14 {dimension_numbers = #tpu.dot_dimension_numbers<[1], [0], [0], [1], [0, 0, 1, 1], [], []>} : vector<64x128xbf16>, vector<128x256xbf16>, vector<64x256xf32> -> vector<64x256xf32>
    %28 = vector.extract_strided_slice %27 {offsets = [0, 0], sizes = [64, 128], strides = [1, 1]} : vector<64x256xf32> to vector<64x128xf32>
    %29 = arith.addf %16, %28 : vector<64x128xf32>
    %30 = vector.extract_strided_slice %27 {offsets = [0, 128], sizes = [64, 128], strides = [1, 1]} : vector<64x256xf32> to vector<64x128xf32>
    %31 = arith.addf %18, %30 : vector<64x128xf32>
    %32 = vector.extract_strided_slice %5 {offsets = [1, 0, 0], sizes = [4, 16, 128], strides = [1, 1, 1]} : vector<6x16x128xbf16> to vector<4x16x128xbf16>
    %33 = vector.shape_cast %32 : vector<4x16x128xbf16> to vector<64x128xbf16>
    %c1 = arith.constant 1 : index
    %c0_15 = arith.constant 0 : index
    %c0_16 = arith.constant 0 : index
    %34 = vector.load %arg5[%c1, %c0_15, %c0_16] : memref<4x128x256xbf16, #tpu.memory_space<vmem>>, vector<1x128x256xbf16>
    %35 = vector.shape_cast %34 : vector<1x128x256xbf16> to vector<128x256xbf16>
    %cst_17 = arith.constant dense<0.000000e+00> : vector<64x256xf32>
    %36 = tpu.matmul %33, %35, %cst_17 {dimension_numbers = #tpu.dot_dimension_numbers<[1], [0], [0], [1], [0, 0, 1, 1], [], []>} : vector<64x128xbf16>, vector<128x256xbf16>, vector<64x256xf32> -> vector<64x256xf32>
    %37 = vector.extract_strided_slice %36 {offsets = [0, 0], sizes = [64, 128], strides = [1, 1]} : vector<64x256xf32> to vector<64x128xf32>
    %38 = arith.addf %29, %37 : vector<64x128xf32>
    %39 = vector.extract_strided_slice %36 {offsets = [0, 128], sizes = [64, 128], strides = [1, 1]} : vector<64x256xf32> to vector<64x128xf32>
    %40 = arith.addf %20, %39 : vector<64x128xf32>
    %41 = vector.extract_strided_slice %7 {offsets = [1, 0, 0], sizes = [4, 16, 128], strides = [1, 1, 1]} : vector<6x16x128xbf16> to vector<4x16x128xbf16>
    %42 = vector.shape_cast %41 : vector<4x16x128xbf16> to vector<64x128xbf16>
    %c2 = arith.constant 2 : index
    %c0_18 = arith.constant 0 : index
    %c0_19 = arith.constant 0 : index
    %43 = vector.load %arg5[%c2, %c0_18, %c0_19] : memref<4x128x256xbf16, #tpu.memory_space<vmem>>, vector<1x128x256xbf16>
    %44 = vector.shape_cast %43 : vector<1x128x256xbf16> to vector<128x256xbf16>
    %cst_20 = arith.constant dense<0.000000e+00> : vector<64x256xf32>
    %45 = tpu.matmul %42, %44, %cst_20 {dimension_numbers = #tpu.dot_dimension_numbers<[1], [0], [0], [1], [0, 0, 1, 1], [], []>} : vector<64x128xbf16>, vector<128x256xbf16>, vector<64x256xf32> -> vector<64x256xf32>
    %46 = vector.extract_strided_slice %45 {offsets = [0, 0], sizes = [64, 128], strides = [1, 1]} : vector<64x256xf32> to vector<64x128xf32>
    %47 = arith.addf %31, %46 : vector<64x128xf32>
    %48 = vector.extract_strided_slice %45 {offsets = [0, 128], sizes = [64, 128], strides = [1, 1]} : vector<64x256xf32> to vector<64x128xf32>
    %49 = arith.addf %22, %48 : vector<64x128xf32>
    %50 = vector.extract_strided_slice %6 {offsets = [2, 0, 0], sizes = [4, 16, 128], strides = [1, 1, 1]} : vector<6x16x128xbf16> to vector<4x16x128xbf16>
    %51 = vector.shape_cast %50 : vector<4x16x128xbf16> to vector<64x128xbf16>
    %c3 = arith.constant 3 : index
    %c0_21 = arith.constant 0 : index
    %c0_22 = arith.constant 0 : index
    %52 = vector.load %arg5[%c3, %c0_21, %c0_22] : memref<4x128x256xbf16, #tpu.memory_space<vmem>>, vector<1x128x256xbf16>
    %53 = vector.shape_cast %52 : vector<1x128x256xbf16> to vector<128x256xbf16>
    %cst_23 = arith.constant dense<0.000000e+00> : vector<64x256xf32>
    %54 = tpu.matmul %51, %53, %cst_23 {dimension_numbers = #tpu.dot_dimension_numbers<[1], [0], [0], [1], [0, 0, 1, 1], [], []>} : vector<64x128xbf16>, vector<128x256xbf16>, vector<64x256xf32> -> vector<64x256xf32>
    %55 = vector.extract_strided_slice %54 {offsets = [0, 0], sizes = [64, 128], strides = [1, 1]} : vector<64x256xf32> to vector<64x128xf32>
    %56 = arith.addf %40, %55 : vector<64x128xf32>
    %57 = vector.extract_strided_slice %54 {offsets = [0, 128], sizes = [64, 128], strides = [1, 1]} : vector<64x256xf32> to vector<64x128xf32>
    %58 = arith.addf %49, %57 : vector<64x128xf32>
    %59 = vector.extract_strided_slice %5 {offsets = [0, 0, 0], sizes = [4, 16, 128], strides = [1, 1, 1]} : vector<6x16x128xbf16> to vector<4x16x128xbf16>
    %60 = vector.shape_cast %59 : vector<4x16x128xbf16> to vector<64x128xbf16>
    %c0_24 = arith.constant 0 : index
    %c0_25 = arith.constant 0 : index
    %c0_26 = arith.constant 0 : index
    %61 = vector.load %arg4[%c0_24, %c0_25, %c0_26] : memref<4x128x128xbf16, #tpu.memory_space<vmem>>, vector<1x128x128xbf16>
    %62 = vector.shape_cast %61 : vector<1x128x128xbf16> to vector<128x128xbf16>
    %cst_27 = arith.constant dense<0.000000e+00> : vector<64x128xf32>
    %63 = tpu.matmul %60, %62, %cst_27 {dimension_numbers = #tpu.dot_dimension_numbers<[1], [0], [0], [1], [0, 0, 1, 1], [], []>} : vector<64x128xbf16>, vector<128x128xbf16>, vector<64x128xf32> -> vector<64x128xf32>
    %64 = arith.addf %38, %63 : vector<64x128xf32>
    %65 = vector.extract_strided_slice %7 {offsets = [0, 0, 0], sizes = [4, 16, 128], strides = [1, 1, 1]} : vector<6x16x128xbf16> to vector<4x16x128xbf16>
    %66 = vector.shape_cast %65 : vector<4x16x128xbf16> to vector<64x128xbf16>
    %c1_28 = arith.constant 1 : index
    %c0_29 = arith.constant 0 : index
    %c0_30 = arith.constant 0 : index
    %67 = vector.load %arg4[%c1_28, %c0_29, %c0_30] : memref<4x128x128xbf16, #tpu.memory_space<vmem>>, vector<1x128x128xbf16>
    %68 = vector.shape_cast %67 : vector<1x128x128xbf16> to vector<128x128xbf16>
    %cst_31 = arith.constant dense<0.000000e+00> : vector<64x128xf32>
    %69 = tpu.matmul %66, %68, %cst_31 {dimension_numbers = #tpu.dot_dimension_numbers<[1], [0], [0], [1], [0, 0, 1, 1], [], []>} : vector<64x128xbf16>, vector<128x128xbf16>, vector<64x128xf32> -> vector<64x128xf32>
    %70 = arith.addf %47, %69 : vector<64x128xf32>
    %71 = vector.extract_strided_slice %5 {offsets = [2, 0, 0], sizes = [4, 16, 128], strides = [1, 1, 1]} : vector<6x16x128xbf16> to vector<4x16x128xbf16>
    %72 = vector.shape_cast %71 : vector<4x16x128xbf16> to vector<64x128xbf16>
    %c2_32 = arith.constant 2 : index
    %c0_33 = arith.constant 0 : index
    %c0_34 = arith.constant 0 : index
    %73 = vector.load %arg4[%c2_32, %c0_33, %c0_34] : memref<4x128x128xbf16, #tpu.memory_space<vmem>>, vector<1x128x128xbf16>
    %74 = vector.shape_cast %73 : vector<1x128x128xbf16> to vector<128x128xbf16>
    %cst_35 = arith.constant dense<0.000000e+00> : vector<64x128xf32>
    %75 = tpu.matmul %72, %74, %cst_35 {dimension_numbers = #tpu.dot_dimension_numbers<[1], [0], [0], [1], [0, 0, 1, 1], [], []>} : vector<64x128xbf16>, vector<128x128xbf16>, vector<64x128xf32> -> vector<64x128xf32>
    %76 = arith.addf %56, %75 : vector<64x128xf32>
    %77 = vector.extract_strided_slice %7 {offsets = [2, 0, 0], sizes = [4, 16, 128], strides = [1, 1, 1]} : vector<6x16x128xbf16> to vector<4x16x128xbf16>
    %78 = vector.shape_cast %77 : vector<4x16x128xbf16> to vector<64x128xbf16>
    %c3_36 = arith.constant 3 : index
    %c0_37 = arith.constant 0 : index
    %c0_38 = arith.constant 0 : index
    %79 = vector.load %arg4[%c3_36, %c0_37, %c0_38] : memref<4x128x128xbf16, #tpu.memory_space<vmem>>, vector<1x128x128xbf16>
    %80 = vector.shape_cast %79 : vector<1x128x128xbf16> to vector<128x128xbf16>
    %cst_39 = arith.constant dense<0.000000e+00> : vector<64x128xf32>
    %81 = tpu.matmul %78, %80, %cst_39 {dimension_numbers = #tpu.dot_dimension_numbers<[1], [0], [0], [1], [0, 0, 1, 1], [], []>} : vector<64x128xbf16>, vector<128x128xbf16>, vector<64x128xf32> -> vector<64x128xf32>
    %82 = arith.addf %58, %81 : vector<64x128xf32>
    %83 = vector.shape_cast %64 : vector<64x128xf32> to vector<4x16x128xf32>
    %84 = arith.truncf %83 : vector<4x16x128xf32> to vector<4x16x128xbf16>
    %c0_40 = arith.constant 0 : index
    %c0_41 = arith.constant 0 : index
    %c0_42 = arith.constant 0 : index
    %c0_43 = arith.constant 0 : index
    %c0_44 = arith.constant 0 : index
    %85 = vector.load %arg8[%c0_40, %c0_41, %c0_42, %c0_43, %c0_44] : memref<1x4x4x16x128xbf16, #tpu.memory_space<vmem>>, vector<1x1x4x16x128xbf16>
    %86 = vector.shape_cast %85 : vector<1x1x4x16x128xbf16> to vector<4x16x128xbf16>
    %87 = vector.shape_cast %84 : vector<4x16x128xbf16> to vector<1x1x4x16x128xbf16>
    tpu.vector_store %arg8[%c0_40, %c0_41, %c0_42, %c0_43, %c0_44], %87 {strides = array<i32>} : memref<1x4x4x16x128xbf16, #tpu.memory_space<vmem>>, vector<1x1x4x16x128xbf16>,
    %88 = vector.shape_cast %70 : vector<64x128xf32> to vector<4x16x128xf32>
    %89 = arith.truncf %88 : vector<4x16x128xf32> to vector<4x16x128xbf16>
    %c0_45 = arith.constant 0 : index
    %c1_46 = arith.constant 1 : index
    %c0_47 = arith.constant 0 : index
    %c0_48 = arith.constant 0 : index
    %c0_49 = arith.constant 0 : index
    %90 = vector.load %arg8[%c0_45, %c1_46, %c0_47, %c0_48, %c0_49] : memref<1x4x4x16x128xbf16, #tpu.memory_space<vmem>>, vector<1x1x4x16x128xbf16>
    %91 = vector.shape_cast %90 : vector<1x1x4x16x128xbf16> to vector<4x16x128xbf16>
    %92 = vector.shape_cast %89 : vector<4x16x128xbf16> to vector<1x1x4x16x128xbf16>
    tpu.vector_store %arg8[%c0_45, %c1_46, %c0_47, %c0_48, %c0_49], %92 {strides = array<i32>} : memref<1x4x4x16x128xbf16, #tpu.memory_space<vmem>>, vector<1x1x4x16x128xbf16>,
    %93 = vector.shape_cast %76 : vector<64x128xf32> to vector<4x16x128xf32>
    %94 = arith.truncf %93 : vector<4x16x128xf32> to vector<4x16x128xbf16>
    %c0_50 = arith.constant 0 : index
    %c2_51 = arith.constant 2 : index
    %c0_52 = arith.constant 0 : index
    %c0_53 = arith.constant 0 : index
    %c0_54 = arith.constant 0 : index
    %95 = vector.load %arg8[%c0_50, %c2_51, %c0_52, %c0_53, %c0_54] : memref<1x4x4x16x128xbf16, #tpu.memory_space<vmem>>, vector<1x1x4x16x128xbf16>
    %96 = vector.shape_cast %95 : vector<1x1x4x16x128xbf16> to vector<4x16x128xbf16>
    %97 = vector.shape_cast %94 : vector<4x16x128xbf16> to vector<1x1x4x16x128xbf16>
    tpu.vector_store %arg8[%c0_50, %c2_51, %c0_52, %c0_53, %c0_54], %97 {strides = array<i32>} : memref<1x4x4x16x128xbf16, #tpu.memory_space<vmem>>, vector<1x1x4x16x128xbf16>,
    %98 = vector.shape_cast %82 : vector<64x128xf32> to vector<4x16x128xf32>
    %99 = arith.truncf %98 : vector<4x16x128xf32> to vector<4x16x128xbf16>
    %c0_55 = arith.constant 0 : index
    %c3_56 = arith.constant 3 : index
    %c0_57 = arith.constant 0 : index
    %c0_58 = arith.constant 0 : index
    %c0_59 = arith.constant 0 : index
    %100 = vector.load %arg8[%c0_55, %c3_56, %c0_57, %c0_58, %c0_59] : memref<1x4x4x16x128xbf16, #tpu.memory_space<vmem>>, vector<1x1x4x16x128xbf16>
    %101 = vector.shape_cast %100 : vector<1x1x4x16x128xbf16> to vector<4x16x128xbf16>
    %102 = vector.shape_cast %99 : vector<4x16x128xbf16> to vector<1x1x4x16x128xbf16>
    tpu.vector_store %arg8[%c0_55, %c3_56, %c0_57, %c0_58, %c0_59], %102 {strides = array<i32>} : memref<1x4x4x16x128xbf16, #tpu.memory_space<vmem>>, vector<1x1x4x16x128xbf16>,
    return
  }
  func.func @transform_0(%arg0: i32, %arg1: i32) -> (i32, i32, i32, i32) {
    %c0_i32 = arith.constant 0 : i32
    %c0_i32_0 = arith.constant 0 : i32
    %c0_i32_1 = arith.constant 0 : i32
    return %arg0, %arg1, %c0_i32, %c0_i32_0 : i32, i32, i32, i32
  }
  func.func @transform_1(%arg0: i32, %arg1: i32) -> (i32, i32, i32, i32) {
    %c1_i32 = arith.constant 1 : i32
    %0 = arith.addi %arg1, %c1_i32 : i32
    %c2_i32 = arith.constant 2 : i32
    %1 = arith.muli %0, %c2_i32 : i32
    %c0_i32 = arith.constant 0 : i32
    %c0_i32_0 = arith.constant 0 : i32
    %c0_i32_1 = arith.constant 0 : i32
    return %arg0, %1, %c0_i32, %c0_i32_0 : i32, i32, i32, i32
  }
  func.func @transform_2(%arg0: i32, %arg1: i32) -> (i32, i32, i32) {
    %c0_i32 = arith.constant 0 : i32
    %c0_i32_0 = arith.constant 0 : i32
    %c0_i32_1 = arith.constant 0 : i32
    %c0_i32_2 = arith.constant 0 : i32
    return %c0_i32, %c0_i32_0, %c0_i32_1 : i32, i32, i32
  }
  func.func @transform_3(%arg0: i32, %arg1: i32) -> (i32, i32, i32) {
    %c0_i32 = arith.constant 0 : i32
    %c0_i32_0 = arith.constant 0 : i32
    %c0_i32_1 = arith.constant 0 : i32
    %c0_i32_2 = arith.constant 0 : i32
    return %c0_i32, %c0_i32_0, %c0_i32_1 : i32, i32, i32
  }
  func.func @transform_4(%arg0: i32, %arg1: i32) -> (i32, i32) {
    %c0_i32 = arith.constant 0 : i32
    %c0_i32_0 = arith.constant 0 : i32
    %c0_i32_1 = arith.constant 0 : i32
    return %c0_i32, %c0_i32_0 : i32, i32
  }
  func.func @transform_5(%arg0: i32, %arg1: i32) -> (i32, i32) {
    %c0_i32 = arith.constant 0 : i32
    %c0_i32_0 = arith.constant 0 : i32
    %c0_i32_1 = arith.constant 0 : i32
    return %c0_i32, %c0_i32_0 : i32, i32
  }
  func.func @transform_6(%arg0: i32, %arg1: i32) -> (i32, i32, i32, i32, i32) {
    %c0_i32 = arith.constant 0 : i32
    %c0_i32_0 = arith.constant 0 : i32
    %c0_i32_1 = arith.constant 0 : i32
    %c0_i32_2 = arith.constant 0 : i32
    return %arg0, %c0_i32, %arg1, %c0_i32_0, %c0_i32_1 : i32, i32, i32, i32, i32
  }
}

</mosaic_0001>

<bundles_post_ra>
// kernel: upsample_forward.1
= control target key start
LH: loop header
LB: loop body
LE: loop exit
PB: predicated region body
PF: predicated region fallthrough
CT: control target
= control target key end

     0   :  { %s4904_s0 = inlined_call_operand.vmem [shape: bf16[2,18,24,128], index: 0, kind: input, shape index: {}, may-alias: {0,1}]   ;;  %s4905_s1 = inlined_call_operand.vmem [shape: bf16[2,18,24,128], index: 1, kind: input, shape index: {}, may-alias: {0,1}]   ;;  %s4906_s2 = inlined_call_operand.vmem [shape: bf16[4,128,128], index: 2, kind: input, shape index: {}]   ;;  %s4907_s3 = inlined_call_operand.vmem [shape: bf16[4,128,256], index: 3, kind: input, shape index: {}]   ;;  %s4908_s4 = inlined_call_operand.vmem [shape: bf16[128,512], index: 4, kind: input, shape index: {}]   ;;  %s4909_s5 = inlined_call_operand.vmem [shape: f32[1,128], index: 5, kind: input, shape index: {}]   ;;  %s4910_s6 = inlined_call_operand.vmem [shape: bf16[2,4,16,16,128], index: 6, kind: output, shape index: {}]  }
   0x1   :  { %4911 = sst [smem:[#allocation3_spill]] %s4908_s4 }
   0x2   :  { %s3504_s21 = smov 0   ;;  %s3506_s22 = smov 0  }
   0x3   :  { %s3508_s23 = smov 0   ;;  %s3510_s24 = smov 0  }
   0x4   :  { %s3512_s25 = smov 0   ;;  %s3514_s26 = smov 0  }
   0x5   :  { %s3516_s27 = smov 0  }
   0x6 LB: > { %s25_s28 = sadd.s32 1, %s3459_s25  ;;  %s28_s29 = sadd.s32 1, %s3463_s26  ;;  %s3467_s27 = sphi %s3516_s27, %s16_s27   ;;  %s3463_s26 = sphi %s3514_s26, %s4926_s26   ;;  %s3459_s25 = sphi %s3512_s25, %s4925_s25   ;;  %s3455_s24 = sphi %s3510_s24, %s4924_s24   ;;  %s3451_s23 = sphi %s3508_s23, %s4923_s23   ;;  %s3447_s22 = sphi %s3506_s22, %s4922_s22   ;;  %s3443_s21 = sphi %s3504_s21, %s4921_s21  }
   0x7   : > { %p26_p0 = scmp.ge.s32.totalorder %s25_s28, 4  ;;  %s2432_s30 = sadd.s32 4294967295, %s3467_s27  }
   0x8   : > { %p191_p1 = scmp.ne.s32.totalorder %s3447_s22, %s3443_s21  ;;  %p192_p2 = scmp.eq.s32.totalorder %s2432_s30, 7 }
   0x9   : > { %s4928_s28 = smov (%p26_p0, %s25_s28), 0  ;;  %s4930_s29 = smov (!%p26_p0, %s28_s29), %s3463_s26 }
   0xa   : > { %s177_s7 = ssub.s32 %s3459_s25, %s4928_s28  ;;  %p30_p3 = scmp.ge.s32.totalorder %s4930_s29, 2 }
   0xb   : > { %p2438_p4 = scmp.ge.s32.totalorder %s3467_s27, 1  ;;  %p3550_p5 = por %p192_p2, %p191_p1 }
   0xc   : > { %p270_p6 = scmp.lt.s32.totalorder %s3467_s27, 9  ;;  %s4932_s29 = smov (%p30_p3, %s4930_s29), 0 }
   0xd   : > { %s176_s9 = ssub.s32 %s3463_s26, %s4932_s29  ;;  %s181_s11 = sadd.s32 1, %s3447_s22 }
   0xe   : > { %p271_p7 = pnand %p2438_p4, %p270_p6  ;;  %s178_s10 = sor.u32 %s177_s7, %s176_s9 }
   0xf   : > { %p179_p8 = scmp.eq.s32.totalorder %s178_s10, 0  ;;  %s4913_s4 = sld [smem:[#allocation3_spill]] (!%p271_p7) }
  0x10   : > { %274 = sbr.rel (%p271_p7) target bundleno = 461 (0x1cd), region = 44  ;;  %s3732_s30 = sshll.u32 (!%p271_p7), %s3451_s23, 2 }
  0x11   : > { %s3561_s12 = scalar_select %p179_p8, %s3447_s22, %s181_s11  }
  0x12   : > { %p327_p9 = scmp.lt.s32.totalorder (!%p271_p7), %s3455_s24, 1  ;;  %p329_p10 = scmp.lt.s32.totalorder (!%p271_p7), %s3732_s30, 17 }
  0x13   : > { %s3337_s19 = sadd.s32 (!%p271_p7), 4, %s3732_s30 }
  0x14   : > { %p3912_p11 = scmp.lt.s32.totalorder (!%p271_p7), %s3337_s19, 17 }
  0x15   : > { %v2559_v0 = vld [vmem:[%s4913_s4 + $0xe0] sm:$0xf]  ;;  %v3157_v1 = vld [vmem:[%s4913_s4 + $0xec] sm:$0xf0]  ;;  %v3155_v2 = vld [vmem:[%s4913_s4 + $0xe4] sm:$0xf] }
  0x16   : > { %v2560_v3 = vor.u32 %v3157_v1, %v2559_v0  ;;  %v2561_v4 = vld [vmem:[%s4913_s4 + $0xf0] sm:$0xf0]  ;;  %v2567_v5 = vld [vmem:[%s4913_s4 + $0xe8] sm:$0xf]  ;;  %v3158_v6 = vld [vmem:[%s4913_s4 + $0xf4] sm:$0xf0] }
  0x17   : > { %v2564_v7 = vor.u32 %v3155_v2, %v2561_v4  ;;  %v2568_v8 = vor.u32 %v3158_v6, %v2567_v5  ;;  %v3156_v9 = vld [vmem:[%s4913_s4 + $0xec] sm:$0xf]  ;;  %v2569_v10 = vld [vmem:[%s4913_s4 + $0xf8] sm:$0xf0]  ;;  %v2543_v11 = vld [vmem:[%s4913_s4 + $0xc0] sm:$0xf] }
  0x18   : > { %687 = vmatpush.bf16.msra.mxu0 %v2560_v3  ;;  %v2572_v12 = vor.u32 %v3156_v9, %v2569_v10  ;;  %v3153_v13 = vld [vmem:[%s4913_s4 + $0xcc] sm:$0xf0]  ;;  %v3151_v14 = vld [vmem:[%s4913_s4 + $0xc4] sm:$0xf]  ;;  %v2545_v15 = vld [vmem:[%s4913_s4 + $0xd0] sm:$0xf0] }
  0x19   : > { %716 = vmatpush.bf16.msra.mxu1 %v2564_v7  ;;  %745 = vmatpush.bf16.msra.mxu2 %v2568_v8  ;;  %v2544_v16 = vor.u32 %v3153_v13, %v2543_v11  ;;  %v2548_v17 = vor.u32 %v3151_v14, %v2545_v15  ;;  %v2551_v18 = vld [vmem:[%s4913_s4 + $0xc8] sm:$0xf]  ;;  %v3154_v19 = vld [vmem:[%s4913_s4 + $0xd4] sm:$0xf0]  ;;  %v3152_v20 = vld [vmem:[%s4913_s4 + $0xcc] sm:$0xf] }
  0x1a   : > { %774 = vmatpush.bf16.msra.mxu3 %v2572_v12  ;;  %v2552_v21 = vor.u32 %v3154_v19, %v2551_v18  ;;  %v2553_v22 = vld [vmem:[%s4913_s4 + $0xd8] sm:$0xf0]  ;;  %v2527_v23 = vld [vmem:[%s4913_s4 + $0xa0] sm:$0xf]  ;;  %v3149_v24 = vld [vmem:[%s4913_s4 + $0xac] sm:$0xf0] }
  0x1b   : > { %v2556_v25 = vor.u32 %v3152_v20, %v2553_v22  ;;  %v3147_v26 = vld [vmem:[%s4913_s4 + $0xa4] sm:$0xf]  ;;  %v2529_v27 = vld [vmem:[%s4913_s4 + $0xb0] sm:$0xf0]  ;;  %v2535_v28 = vld [vmem:[%s4913_s4 + $0xa8] sm:$0xf]  ;;  %v2528_v29 = vor.u32 %v3149_v24, %v2527_v23 }
  0x1c   : > { %688 = vmatpush.bf16.msra.mxu0 %v2544_v16  ;;  %v3150_v30 = vld [vmem:[%s4913_s4 + $0xb4] sm:$0xf0]  ;;  %v3148_v31 = vld [vmem:[%s4913_s4 + $0xac] sm:$0xf]  ;;  %v2537_v32 = vld [vmem:[%s4913_s4 + $0xb8] sm:$0xf0]  ;;  %v2532_v33 = vor.u32 %v3147_v26, %v2529_v27 }
  0x1d   : > { %717 = vmatpush.bf16.msra.mxu1 %v2548_v17  ;;  %746 = vmatpush.bf16.msra.mxu2 %v2552_v21  ;;  %v2536_v34 = vor.u32 %v3150_v30, %v2535_v28  ;;  %v2511_v35 = vld [vmem:[%s4913_s4 + $0x80] sm:$0xf]  ;;  %v3145_v36 = vld [vmem:[%s4913_s4 + $0x8c] sm:$0xf0]  ;;  %v3143_v37 = vld [vmem:[%s4913_s4 + $0x84] sm:$0xf]  ;;  %v2540_v38 = vor.u32 %v3148_v31, %v2537_v32 }
  0x1e   : > { %775 = vmatpush.bf16.msra.mxu3 %v2556_v25  ;;  %v2513_v39 = vld [vmem:[%s4913_s4 + $0x90] sm:$0xf0]  ;;  %v2519_v40 = vld [vmem:[%s4913_s4 + $0x88] sm:$0xf]  ;;  %v3146_v41 = vld [vmem:[%s4913_s4 + $0x94] sm:$0xf0]  ;;  %v2512_v44 = vor.u32 %v3145_v36, %v2511_v35 }
  0x1f   : > { %v3144_v42 = vld [vmem:[%s4913_s4 + $0x8c] sm:$0xf]  ;;  %v2521_v43 = vld [vmem:[%s4913_s4 + $0x98] sm:$0xf0]  ;;  %v2516_v45 = vor.u32 %v3143_v37, %v2513_v39  ;;  %v2520_v46 = vor.u32 %v3146_v41, %v2519_v40  ;;  %v2495_v47 = vld [vmem:[%s4913_s4 + $0x60] sm:$0xf] }
  0x20   : > { %689 = vmatpush.bf16.msra.mxu0 %v2528_v29  ;;  %v3141_v48 = vld [vmem:[%s4913_s4 + $0x6c] sm:$0xf0]  ;;  %v3139_v49 = vld [vmem:[%s4913_s4 + $0x64] sm:$0xf]  ;;  %v2524_v50 = vor.u32 %v3144_v42, %v2521_v43  ;;  %v2497_v51 = vld [vmem:[%s4913_s4 + $0x70] sm:$0xf0] }
  0x21   : > { %718 = vmatpush.bf16.msra.mxu1 %v2532_v33  ;;  %747 = vmatpush.bf16.msra.mxu2 %v2536_v34  ;;  %v2503_v52 = vld [vmem:[%s4913_s4 + $0x68] sm:$0xf]  ;;  %v3142_v53 = vld [vmem:[%s4913_s4 + $0x74] sm:$0xf0]  ;;  %v3140_v54 = vld [vmem:[%s4913_s4 + $0x6c] sm:$0xf]  ;;  %v2496_v56 = vor.u32 %v3141_v48, %v2495_v47  ;;  %v2500_v57 = vor.u32 %v3139_v49, %v2497_v51 }
  0x22   : > { %776 = vmatpush.bf16.msra.mxu3 %v2540_v38  ;;  %v2505_v55 = vld [vmem:[%s4913_s4 + $0x78] sm:$0xf0]  ;;  %v2504_v58 = vor.u32 %v3142_v53, %v2503_v52  ;;  %v2479_v59 = vld [vmem:[%s4913_s4 + $0x40] sm:$0xf]  ;;  %v3137_v60 = vld [vmem:[%s4913_s4 + $0x4c] sm:$0xf0] }
  0x23   : > { %v3135_v61 = vld [vmem:[%s4913_s4 + $0x44] sm:$0xf]  ;;  %v2508_v62 = vor.u32 %v3140_v54, %v2505_v55  ;;  %v2481_v63 = vld [vmem:[%s4913_s4 + $0x50] sm:$0xf0]  ;;  %v2487_v0 = vld [vmem:[%s4913_s4 + $0x48] sm:$0xf]  ;;  %v2480_v4 = vor.u32 %v3137_v60, %v2479_v59 }
  0x24   : > { %690 = vmatpush.bf16.msra.mxu0 %v2512_v44  ;;  %v3138_v1 = vld [vmem:[%s4913_s4 + $0x54] sm:$0xf0]  ;;  %v3136_v2 = vld [vmem:[%s4913_s4 + $0x4c] sm:$0xf]  ;;  %v2489_v3 = vld [vmem:[%s4913_s4 + $0x58] sm:$0xf0]  ;;  %v2484_v8 = vor.u32 %v3135_v61, %v2481_v63 }
  0x25   : > { %719 = vmatpush.bf16.msra.mxu1 %v2516_v45  ;;  %748 = vmatpush.bf16.msra.mxu2 %v2520_v46  ;;  %v2463_v5 = vld [vmem:[%s4913_s4 + $0x20] sm:$0xf]  ;;  %v3133_v6 = vld [vmem:[%s4913_s4 + $0x2c] sm:$0xf0]  ;;  %v3131_v7 = vld [vmem:[%s4913_s4 + $0x24] sm:$0xf]  ;;  %v2488_v9 = vor.u32 %v3138_v1, %v2487_v0  ;;  %v2492_v13 = vor.u32 %v3136_v2, %v2489_v3 }
  0x26   : > { %777 = vmatpush.bf16.msra.mxu3 %v2524_v50  ;;  %v2465_v10 = vld [vmem:[%s4913_s4 + $0x30] sm:$0xf0]  ;;  %v2471_v11 = vld [vmem:[%s4913_s4 + $0x28] sm:$0xf]  ;;  %v3134_v12 = vld [vmem:[%s4913_s4 + $0x34] sm:$0xf0]  ;;  %v2464_v18 = vor.u32 %v3133_v6, %v2463_v5 }
  0x27   : > { %v3132_v14 = vld [vmem:[%s4913_s4 + $0x2c] sm:$0xf]  ;;  %v2473_v15 = vld [vmem:[%s4913_s4 + $0x38] sm:$0xf0]  ;;  %v2447_v16 = vld [vmem:[%s4913_s4] sm:$0xf]  ;;  %v2468_v23 = vor.u32 %v3131_v7, %v2465_v10  ;;  %v2472_v24 = vor.u32 %v3134_v12, %v2471_v11 }
  0x28   : > { %691 = vmatpush.bf16.msra.mxu0 %v2496_v56  ;;  %v3129_v17 = vld [vmem:[%s4913_s4 + $0xc] sm:$0xf0]  ;;  %v3127_v19 = vld [vmem:[%s4913_s4 + $0x4] sm:$0xf]  ;;  %v2449_v20 = vld [vmem:[%s4913_s4 + $0x10] sm:$0xf0]  ;;  %v2476_v29 = vor.u32 %v3132_v14, %v2473_v15 }
  0x29   : > { %720 = vmatpush.bf16.msra.mxu1 %v2500_v57  ;;  %749 = vmatpush.bf16.msra.mxu2 %v2504_v58  ;;  %v2455_v21 = vld [vmem:[%s4913_s4 + $0x8] sm:$0xf]  ;;  %v3130_v22 = vld [vmem:[%s4913_s4 + $0x14] sm:$0xf0]  ;;  %s3755_s7 = scalar_select %p327_p9, %s3455_s24, 1  ;;  %v2448_v36 = vor.u32 %v3129_v17, %v2447_v16  ;;  %v2452_v40 = vor.u32 %v3127_v19, %v2449_v20  ;;  %vm1232_vm3 = vcmask 1042432  }
  0x2a   : > { %778 = vmatpush.bf16.msra.mxu3 %v2508_v62  ;;  %v3128_v25 = vld [vmem:[%s4913_s4 + $0xc] sm:$0xf]  ;;  %v2457_v26 = vld [vmem:[%s4913_s4 + $0x18] sm:$0xf0]  ;;  %s330_s14 = scalar_select %p329_p10, %s3732_s30, 17  ;;  %v2456_v41 = vor.u32 %v3130_v22, %v2455_v21  ;;  %vm1233_vm4 = vcmask 1046532  }
  0x2b   : > { %v2727_v27 = vld [vmem:[%s4907_s3 + $0xf0] sm:$0xf]  ;;  %v3190_v28 = vld [vmem:[%s4907_s3 + $0xf4] sm:$0xf0]  ;;  %v3189_v30 = vld [vmem:[%s4907_s3 + $0xf4] sm:$0xf]  ;;  %v2460_v45 = vor.u32 %v3128_v25, %v2457_v26 }
  0x2c   : > { %692 = vmatpush.bf16.msra.mxu0 %v2480_v4  ;;  %v2729_v31 = vld [vmem:[%s4907_s3 + $0xf8] sm:$0xf0]  ;;  %v2631_v32 = vld [vmem:[%s4907_s3 + $0x70] sm:$0xf]  ;;  %v3174_v33 = vld [vmem:[%s4907_s3 + $0x74] sm:$0xf0]  ;;  %v2728_v46 = vor.u32 %v3190_v28, %v2727_v27 }
  0x2d   : > { %721 = vmatpush.bf16.msra.mxu1 %v2484_v8  ;;  %750 = vmatpush.bf16.msra.mxu2 %v2488_v9  ;;  %s3353_s17 = smul.u32 3, %s330_s14  ;;  %vm380_vm0 = vsmask.f32 3328  ;;  %vm381_vm1 = vsmask.f32 7440  ;;  %v2732_v48 = vor.u32 %v3189_v30, %v2729_v31  ;;  %v2632_v49 = vor.u32 %v3174_v33, %v2631_v32  ;;  %s4934_s19 = smov (!%p3912_p11, %s3337_s19), 17  ;;  %vm4392_vm5 = vmor %vm1232_vm3, %vm1233_vm4 }
  0x2e   : > { %779 = vmatpush.bf16.msra.mxu3 %v2492_v13  ;;  %v3173_v34 = vld [vmem:[%s4907_s3 + $0x74] sm:$0xf]  ;;  %v2633_v35 = vld [vmem:[%s4907_s3 + $0x78] sm:$0xf0]  ;;  %v3794_v37 = vld [vmem:[%s4907_s3 + $0xe0] sm:$0xf] }
  0x2f   : > { %v3799_v38 = vld [vmem:[%s4907_s3 + $0xe4] sm:$0xf0]  ;;  %v3804_v39 = vld [vmem:[%s4907_s3 + $0xe4] sm:$0xf]  ;;  %s4914_s15 = smul.u32 54, %s3755_s7  ;;  %v2636_v56 = vor.u32 %v3173_v34, %v2633_v35  ;;  %vm3900_vm2 = vmor %vm380_vm0, %vm381_vm1  ;;  %s3110_s14 = sshll.u32 (%p3550_p5), %s3455_s24, 7 }
  0x30   : > { %693 = vmatpush.bf16.msra.mxu0 %v2464_v18  ;;  %v3811_v42 = vld [vmem:[%s4907_s3 + $0xe8] sm:$0xf0]  ;;  %v3816_v43 = vld [vmem:[%s4907_s3 + $0x60] sm:$0xf]  ;;  %v3821_v44 = vld [vmem:[%s4907_s3 + $0x64] sm:$0xf0]  ;;  %v2720_v57 = vor.u32 %v3799_v38, %v3794_v37 }
  0x31   : > { %722 = vmatpush.bf16.msra.mxu1 %v2468_v23  ;;  %751 = vmatpush.bf16.msra.mxu2 %v2472_v24  ;;  %s333_s16 = sadd.s32 %s4914_s15, %s3353_s17  ;;  %v3826_v47 = vld [vmem:[%s4907_s3 + $0x64] sm:$0xf]  ;;  %v2625_v50 = vld [vmem:[%s4907_s3 + $0x68] sm:$0xf0]  ;;  %v3840_v51 = vld [vmem:[%s4907_s3 + $0xd0] sm:$0xf]  ;;  %v2724_v58 = vor.u32 %v3804_v39, %v3811_v42  ;;  %v2624_v2 = vor.u32 %v3821_v44, %v3816_v43 }
  0x32   : > { %780 = vmatpush.bf16.msra.mxu3 %v2476_v29  ;;  %s2441_s13 = sshll.u32 %s333_s16, 2  ;;  %v3845_v52 = vld [vmem:[%s4907_s3 + $0xd4] sm:$0xf0]  ;;  %v3185_v0 = vld [vmem:[%s4907_s3 + $0xd4] sm:$0xf]  ;;  %v2628_v3 = vor.u32 %v3826_v47, %v2625_v50  ;;  %s3355_s30 = smul.u32 3, %s4934_s19 }
  0x33   : > { %s3832_s20 = scalar_lea.vmem %s4904_s0, %s2441_s13  ;;  %v2713_v11 = vld [vmem:[%s4907_s3 + $0xd8] sm:$0xf0]  ;;  %v2712_v15 = vor.u32 %v3845_v52, %v3840_v51  ;;  %v2615_v16 = vld [vmem:[%s4907_s3 + $0x50] sm:$0xf]  ;;  %v3170_v21 = vld [vmem:[%s4907_s3 + $0x54] sm:$0xf0] }
  0x34   : > { %694 = vmatpush.bf16.msra.mxu0 %v2448_v36  ;;  %v3848_v53 = vld [vmem:[%s3832_s20 + $0xc] sm:$0xf]  ;;  %v3851_v54 = vld [vmem:[%s3832_s20 + $0x10] sm:$0xf]  ;;  %v3854_v55 = vld [vmem:[%s3832_s20 + $0x14] sm:$0xf]  ;;  %v2716_v27 = vor.u32 %v3185_v0, %v2713_v11  ;;  %v2616_v32 = vor.u32 %v3170_v21, %v2615_v16 }
  0x35   : > { %723 = vmatpush.bf16.msra.mxu1 %v2452_v40  ;;  %752 = vmatpush.bf16.msra.mxu2 %v2456_v41  ;;  %v384_v59 = vshrl.u32 %v3848_v53, 16  ;;  %v387_v60 = vshll.u32 %v3848_v53, 16  ;;  %v393_v61 = vshll.u32 %v3851_v54, 16  ;;  %v397_v62 = vshrl.u32 %v3851_v54, 16  ;;  %v3865_v63 = vld [vmem:[%s3832_s20 + $0x18] sm:$0xf] }
  0x36   : > { %781 = vmatpush.bf16.msra.mxu3 %v2460_v45  ;;  %v403_v1 = vshll.u32 %v3854_v55, 16  ;;  %v3875_v4 = vld [vmem:[%s3832_s20 + $0x1c] sm:$0xf]  ;;  %v3878_v5 = vld [vmem:[%s3832_s20 + $0x20] sm:$0xf]  ;;  %v408_v6 = vshrl.u32 %v3865_v63, 16 }
  0x37   : > { %v386_v7 = vrot.slane %v384_v59, 4  ;;  %v389_v8 = vrot.slane %v387_v60, 5  ;;  %v395_v9 = vrot.slane %v393_v61, 5  ;;  %v399_v10 = vrot.slane %v397_v62, 4  ;;  %v3169_v22 = vld [vmem:[%s4907_s3 + $0x54] sm:$0xf] }
  0x38   : > { %959 = vmatpush.bf16.msrb.mxu0 %v2632_v49  ;;  %v405_v12 = vrot.slane %v403_v1, 5  ;;  %v411_v13 = vshll.u32 %v3865_v63, 16  ;;  %v417_v14 = vshll.u32 %v3875_v4, 16  ;;  %v410_v19 = vrot.slane %v408_v6, 4  ;;  %v2617_v28 = vld [vmem:[%s4907_s3 + $0x58] sm:$0xf0] }
  0x39   : > { %1154 = vmatpush.bf16.msrb.mxu2 %v2728_v46  ;;  %988 = vmatpush.bf16.msrb.mxu1 %v2636_v56  ;;  %v390_v17 = vor.u32 %v389_v8, %v386_v7  ;;  %v400_v18 = vor.u32 %v399_v10, %v395_v9  ;;  %v421_v20 = vshrl.u32 %v3875_v4, 16  ;;  %v427_v26 = vshll.u32 %v3878_v5, 16  ;;  %v2703_v34 = vld [vmem:[%s4907_s3 + $0xc0] sm:$0xf]  ;;  %v3184_v35 = vld [vmem:[%s4907_s3 + $0xc4] sm:$0xf0] }
  0x3a   : > { %1183 = vmatpush.bf16.msrb.mxu3 %v2732_v48  ;;  %v413_v24 = vrot.slane %v411_v13, 5  ;;  %v3904_v25 = vrot.slane %v417_v14, 5  ;;  %v2620_v33 = vor.u32 %v3169_v22, %v2617_v28  ;;  %v3183_v36 = vld [vmem:[%s4907_s3 + $0xc4] sm:$0xf]  ;;  %v2705_v39 = vld [vmem:[%s4907_s3 + $0xc8] sm:$0xf0]  ;;  %v2704_v50 = vor.u32 %v3184_v35, %v2703_v34 }
  0x3b   : > { %v391_v29 = vrot.slane %v390_v17, 4  ;;  %v401_v30 = vrot.slane %v400_v18, 4  ;;  %v423_v31 = vrot.slane %v421_v20, 4  ;;  %v2607_v40 = vld [vmem:[%s4907_s3 + $0x40] sm:$0xf]  ;;  %v2708_v51 = vor.u32 %v3183_v36, %v2705_v39  ;;  %s4918_s16 = smul.u32 54, %s3755_s7 }
  0x3c   : > { %960 = vmatpush.bf16.msrb.mxu0 %v2624_v2  ;;  %v3168_v41 = vld [vmem:[%s4907_s3 + $0x44] sm:$0xf0]  ;;  %v414_v44 = vor.u32 %v413_v24, %v410_v19  ;;  %v3167_v46 = vld [vmem:[%s4907_s3 + $0x44] sm:$0xf]  ;;  %v2609_v47 = vld [vmem:[%s4907_s3 + $0x48] sm:$0xf0] }
  0x3d   : > { %1155 = vmatpush.bf16.msrb.mxu2 %v2720_v57  ;;  %989 = vmatpush.bf16.msrb.mxu1 %v2628_v3  ;;  %v396_v37 = vsel %vm3900_vm2, %v391_v29, %v395_v9  ;;  %v406_v38 = vsel %vm3900_vm2, %v401_v30, %v405_v12  ;;  %v424_v45 = vor.u32 %v423_v31, %v3904_v25  ;;  %v3952_v48 = vld [vmem:[%s3832_s20 + $0x24] sm:$0xf]  ;;  %v429_v52 = vrot.slane %v427_v26, 5  ;;  %v3959_v60 = vld [vmem:[%s3832_s20 + $0x28] sm:$0xf]  ;;  %s3997_s10 = sadd.s32 %s3355_s30, %s4918_s16 }
  0x3e   : > { %1184 = vmatpush.bf16.msrb.mxu3 %v2724_v58  ;;  %v511_v42 = vunpack.c.l.b16 %v396_v37  ;;  %v512_v43 = vunpack.c.l.b16 %v406_v38  ;;  %v2608_v56 = vor.u32 %v3168_v41, %v2607_v40  ;;  %v2612_v57 = vor.u32 %v3167_v46, %v2609_v47  ;;  %v2695_v62 = vld [vmem:[%s4907_s3 + $0xb0] sm:$0xf]  ;;  %v3182_v0 = vld [vmem:[%s4907_s3 + $0xb4] sm:$0xf0]  ;;  %v3181_v1 = vld [vmem:[%s4907_s3 + $0xb4] sm:$0xf] }
  0x3f   : > { %v415_v58 = vrot.slane %v414_v44, 4  ;;  %v425_v59 = vrot.slane %v424_v45, 4  ;;  %v432_v61 = vshrl.u32 %v3952_v48, 16  ;;  %v435_v2 = vshll.u32 %v3952_v48, 16  ;;  %v2697_v6 = vld [vmem:[%s4907_s3 + $0xb8] sm:$0xf0] }
  0x40   : > { %961 = vmatpush.bf16.msrb.mxu0 %v2616_v32  ;;  %v3954_v49 = vpack.c.b16 %v512_v43, %v511_v42  ;;  %v2696_v3 = vor.u32 %v3182_v0, %v2695_v62  ;;  %v2599_v7 = vld [vmem:[%s4907_s3 + $0x30] sm:$0xf]  ;;  %v441_v8 = vshll.u32 %v3959_v60, 16  ;;  %v445_v9 = vshrl.u32 %v3959_v60, 16  ;;  %v3166_v11 = vld [vmem:[%s4907_s3 + $0x34] sm:$0xf0] }
  0x41   : > { %1156 = vmatpush.bf16.msrb.mxu2 %v2712_v15  ;;  %990 = vmatpush.bf16.msrb.mxu1 %v2620_v33  ;;  %v2700_v10 = vor.u32 %v3181_v1, %v2697_v6  ;;  %v3165_v12 = vld [vmem:[%s4907_s3 + $0x34] sm:$0xf]  ;;  %v434_v13 = vrot.slane %v432_v61, 4  ;;  %v2600_v14 = vor.u32 %v3166_v11, %v2599_v7  ;;  %v2601_v15 = vld [vmem:[%s4907_s3 + $0x38] sm:$0xf0]  ;;  %v420_v17 = vsel %vm3900_vm2, %v415_v58, %v3904_v25  ;;  %s2444_s15 = sshll.u32 %s3997_s10, 2 }
  0x42   : > { %1185 = vmatpush.bf16.msrb.mxu3 %v2716_v27  ;;  %695 = vmatmul.bf16.vlgmr.msra.gmra.mxu0 %v3954_v49  ;;  %v2687_v16 = vld [vmem:[%s4907_s3 + $0xa0] sm:$0xf]  ;;  %v430_v18 = vsel %vm3900_vm2, %v425_v59, %v429_v52  ;;  %v2604_v19 = vor.u32 %v3165_v12, %v2601_v15  ;;  %v3180_v20 = vld [vmem:[%s4907_s3 + $0xa4] sm:$0xf0]  ;;  %v3179_v21 = vld [vmem:[%s4907_s3 + $0xa4] sm:$0xf]  ;;  %v513_v34 = vunpack.c.l.b16 %v420_v17  ;;  %s4032_s7 = scalar_lea.vmem %s4905_s1, %s2444_s15 }
  0x43   : > { %724 = vmatmul.bf16.vlgmr.msra.gmra.mxu1 %v3954_v49  ;;  %753 = vmatmul.bf16.vlgmr.msra.gmra.mxu2 %v3954_v49  ;;  %v2689_v22 = vld [vmem:[%s4907_s3 + $0xa8] sm:$0xf0]  ;;  %v2688_v24 = vor.u32 %v3180_v20, %v2687_v16  ;;  %v2591_v26 = vld [vmem:[%s4907_s3 + $0x20] sm:$0xf]  ;;  %v3164_v27 = vld [vmem:[%s4907_s3 + $0x24] sm:$0xf0]  ;;  %v514_v35 = vunpack.c.l.b16 %v430_v18 }
  0x44   : > { %782 = vmatmul.bf16.vlgmr.msra.gmra.mxu3 %v3954_v49  ;;  %962 = vmatpush.bf16.msrb.mxu0 %v2608_v56  ;;  %v2692_v25 = vor.u32 %v3179_v21, %v2689_v22  ;;  %v3163_v28 = vld [vmem:[%s4907_s3 + $0x24] sm:$0xf]  ;;  %v437_v29 = vrot.slane %v435_v2, 5  ;;  %v443_v30 = vrot.slane %v441_v8, 5  ;;  %v447_v31 = vrot.slane %v445_v9, 4 }
  0x45   : > { %1157 = vmatpush.bf16.msrb.mxu2 %v2704_v50  ;;  %991 = vmatpush.bf16.msrb.mxu1 %v2612_v57  ;;  %v2592_v32 = vor.u32 %v3164_v27, %v2591_v26  ;;  %v2593_v33 = vld [vmem:[%s4907_s3 + $0x28] sm:$0xf0]  ;;  %v4035_v41 = vpack.c.b16 %v514_v35, %v513_v34  ;;  %v4038_v42 = vld [vmem:[%s4032_s7] sm:$0xf]  ;;  %v4041_v43 = vld [vmem:[%s4032_s7 + $0x4] sm:$0xf] }
  0x46   : > { %1186 = vmatpush.bf16.msrb.mxu3 %v2708_v51  ;;  %v4027_v36 = vld [vmem:[%s3832_s20 + $0x2c] sm:$0xf]  ;;  %v2596_v37 = vor.u32 %v3163_v28, %v2593_v33  ;;  %v438_v38 = vor.u32 %v437_v29, %v434_v13  ;;  %v448_v39 = vor.u32 %v447_v31, %v443_v30  ;;  %v456_v47 = vshrl.u32 %v4038_v42, 16  ;;  %v2679_v56 = vld [vmem:[%s4907_s3 + $0x90] sm:$0xf] }
  0x47   : > { %v451_v40 = vshll.u32 %v4027_v36, 16  ;;  %v459_v50 = vshll.u32 %v4038_v42, 16  ;;  %v465_v51 = vshll.u32 %v4041_v43, 16  ;;  %v469_v52 = vshrl.u32 %v4041_v43, 16  ;;  %v3178_v57 = vld [vmem:[%s4907_s3 + $0x94] sm:$0xf0] }
  0x48   : > { %963 = vmatpush.bf16.msrb.mxu0 %v2600_v14  ;;  %v439_v44 = vrot.slane %v438_v38, 4  ;;  %v449_v45 = vrot.slane %v448_v39, 4  ;;  %v3177_v58 = vld [vmem:[%s4907_s3 + $0x94] sm:$0xf]  ;;  %v2680_v59 = vor.u32 %v3178_v57, %v2679_v56  ;;  %v2681_v61 = vld [vmem:[%s4907_s3 + $0x98] sm:$0xf0] }
  0x49   : > { %1158 = vmatpush.bf16.msrb.mxu2 %v2696_v3  ;;  %992 = vmatpush.bf16.msrb.mxu1 %v2604_v19  ;;  %v453_v46 = vrot.slane %v451_v40, 5  ;;  %v2583_v62 = vld [vmem:[%s4907_s3 + $0x10] sm:$0xf]  ;;  %v3162_v0 = vld [vmem:[%s4907_s3 + $0x14] sm:$0xf0]  ;;  %v2684_v1 = vor.u32 %v3177_v58, %v2681_v61  ;;  %v461_v26 = vrot.slane %v459_v50, 5 }
  0x4a   : > { %1187 = vmatpush.bf16.msrb.mxu3 %v2700_v10  ;;  %v2584_v2 = vor.u32 %v3162_v0, %v2583_v62  ;;  %v3161_v3 = vld [vmem:[%s4907_s3 + $0x14] sm:$0xf]  ;;  %v2585_v6 = vld [vmem:[%s4907_s3 + $0x18] sm:$0xf0]  ;;  %v2671_v7 = vld [vmem:[%s4907_s3 + $0x80] sm:$0xf]  ;;  %v444_v8 = vsel %vm3900_vm2, %v439_v44, %v443_v30 }
  0x4b   : > { %v454_v9 = vsel %vm3900_vm2, %v449_v45, %v453_v46  ;;  %v2588_v10 = vor.u32 %v3161_v3, %v2585_v6  ;;  %v3176_v11 = vld [vmem:[%s4907_s3 + $0x84] sm:$0xf0]  ;;  %v3175_v12 = vld [vmem:[%s4907_s3 + $0x84] sm:$0xf]  ;;  %v2673_v13 = vld [vmem:[%s4907_s3 + $0x88] sm:$0xf0]  ;;  %v515_v21 = vunpack.c.l.b16 %v444_v8 }
  0x4c   : > { %964 = vmatpush.bf16.msrb.mxu0 %v2592_v32  ;;  %v2672_v14 = vor.u32 %v3176_v11, %v2671_v7  ;;  %v2676_v15 = vor.u32 %v3175_v12, %v2673_v13  ;;  %v2575_v16 = vld [vmem:[%s4907_s3] sm:$0xf]  ;;  %v3160_v17 = vld [vmem:[%s4907_s3 + $0x4] sm:$0xf0]  ;;  %v3159_v18 = vld [vmem:[%s4907_s3 + $0x4] sm:$0xf]  ;;  %v516_v22 = vunpack.c.l.b16 %v454_v9 }
  0x4d   : > { %1159 = vmatpush.bf16.msrb.mxu2 %v2688_v24  ;;  %993 = vmatpush.bf16.msrb.mxu1 %v2596_v37  ;;  %v2576_v19 = vor.u32 %v3160_v17, %v2575_v16  ;;  %v2577_v20 = vld [vmem:[%s4907_s3 + $0x8] sm:$0xf0]  ;;  %v467_v27 = vrot.slane %v465_v51, 5  ;;  %v471_v28 = vrot.slane %v469_v52, 4  ;;  %v4104_v29 = vld [vmem:[%s4032_s7 + $0x8] sm:$0xf] }
  0x4e   : > { %1188 = vmatpush.bf16.msrb.mxu3 %v2692_v25  ;;  %v2580_v24 = vor.u32 %v3159_v18, %v2577_v20  ;;  %v458_v25 = vrot.slane %v456_v47, 4  ;;  %v4106_v30 = vpack.c.b16 %v516_v22, %v515_v21  ;;  %v475_v33 = vshll.u32 %v4104_v29, 16  ;;  %v4110_v34 = vld [vmem:[%s3832_s20] sm:$0xf]  ;;  %v4113_v35 = vld [vmem:[%s3832_s20 + $0x4] sm:$0xf] }
  0x4f   : > { %v472_v32 = vor.u32 %v471_v28, %v467_v27  ;;  %v836_v40 = vshrl.u32 %v4110_v34, 16  ;;  %v839_v44 = vshll.u32 %v4110_v34, 16  ;;  %v2891_v45 = vld [vmem:[%s4907_s3 + $0x1f0] sm:$0xf]  ;;  %v3222_v46 = vld [vmem:[%s4907_s3 + $0x1f4] sm:$0xf0] }
  0x50   : > { %965 = vmatpush.bf16.msrb.mxu0 %v2584_v2  ;;  %v462_v31 = vor.u32 %v461_v26, %v458_v25  ;;  %v477_v39 = vrot.slane %v475_v33, 5  ;;  %v845_v47 = vshll.u32 %v4113_v35, 16  ;;  %v849_v50 = vshrl.u32 %v4113_v35, 16  ;;  %v3221_v52 = vld [vmem:[%s4907_s3 + $0x1f4] sm:$0xf] }
  0x51   : > { %1160 = vmatpush.bf16.msrb.mxu2 %v2680_v59  ;;  %994 = vmatpush.bf16.msrb.mxu1 %v2588_v10  ;;  %v473_v38 = vrot.slane %v472_v32, 4  ;;  %v2892_v51 = vor.u32 %v3222_v46, %v2891_v45  ;;  %v2893_v56 = vld [vmem:[%s4907_s3 + $0x1f8] sm:$0xf0]  ;;  %v2811_v58 = vld [vmem:[%s4907_s3 + $0x170] sm:$0xf]  ;;  %v838_v20 = vrot.slane %v836_v40, 4 }
  0x52   : > { %700 = vmatmul.bf16.gmra.mxu0 %v4035_v41  ;;  %1189 = vmatpush.bf16.msrb.mxu3 %v2684_v1  ;;  %v463_v37 = vrot.slane %v462_v31, 4  ;;  %v2896_v57 = vor.u32 %v3221_v52, %v2893_v56  ;;  %v3206_v59 = vld [vmem:[%s4907_s3 + $0x174] sm:$0xf0]  ;;  %v3205_v61 = vld [vmem:[%s4907_s3 + $0x174] sm:$0xf]  ;;  %v841_v21 = vrot.slane %v839_v44, 5 }
  0x53   : > { %729 = vmatmul.bf16.gmra.mxu1 %v4035_v41  ;;  %758 = vmatmul.bf16.gmra.mxu2 %v4035_v41  ;;  %v478_v0 = vsel %vm3900_vm2, %v473_v38, %v477_v39  ;;  %v2812_v1 = vor.u32 %v3206_v59, %v2811_v58  ;;  %v2813_v2 = vld [vmem:[%s4907_s3 + $0x178] sm:$0xf0]  ;;  %v2883_v3 = vld [vmem:[%s4907_s3 + $0x1e0] sm:$0xf]  ;;  %v3220_v6 = vld [vmem:[%s4907_s3 + $0x1e4] sm:$0xf0] }
  0x54   : > { %787 = vmatmul.bf16.gmra.mxu3 %v4035_v41  ;;  %966 = vmatpush.bf16.msrb.mxu0 %v2576_v19  ;;  %v468_v62 = vsel %vm3900_vm2, %v463_v37, %v467_v27  ;;  %v2816_v7 = vor.u32 %v3205_v61, %v2813_v2  ;;  %v2884_v8 = vor.u32 %v3220_v6, %v2883_v3  ;;  %v3219_v9 = vld [vmem:[%s4907_s3 + $0x1e4] sm:$0xf]  ;;  %v2885_v10 = vld [vmem:[%s4907_s3 + $0x1e8] sm:$0xf0]  ;;  %v2803_v11 = vld [vmem:[%s4907_s3 + $0x160] sm:$0xf]  ;;  %v518_v17 = vunpack.c.l.b16 %v478_v0 }
  0x55   : > { %1161 = vmatpush.bf16.msrb.mxu2 %v2672_v14  ;;  %995 = vmatpush.bf16.msrb.mxu1 %v2580_v24  ;;  %v2888_v12 = vor.u32 %v3219_v9, %v2885_v10  ;;  %v3204_v13 = vld [vmem:[%s4907_s3 + $0x164] sm:$0xf0]  ;;  %v3203_v14 = vld [vmem:[%s4907_s3 + $0x164] sm:$0xf]  ;;  %v517_v16 = vunpack.c.l.b16 %v468_v62  ;;  %v847_v22 = vrot.slane %v845_v47, 5  ;;  %v851_v24 = vrot.slane %v849_v50, 4 }
  0x56   : > { %1190 = vmatpush.bf16.msrb.mxu3 %v2676_v15  ;;  %v2805_v15 = vld [vmem:[%s4907_s3 + $0x168] sm:$0xf0]  ;;  %v2804_v18 = vor.u32 %v3204_v13, %v2803_v11  ;;  %v4176_v25 = vld [vmem:[%s3832_s20 + $0x8] sm:$0xf]  ;;  %v842_v27 = vor.u32 %v841_v21, %v838_v20  ;;  %v2875_v38 = vld [vmem:[%s4907_s3 + $0x1d0] sm:$0xf] }
  0x57   : > { %v2808_v19 = vor.u32 %v3203_v14, %v2805_v15  ;;  %v4178_v26 = vpack.c.b16 %v518_v17, %v517_v16  ;;  %v852_v28 = vor.u32 %v851_v24, %v847_v22  ;;  %v855_v31 = vshll.u32 %v4176_v25, 16  ;;  %v3218_v39 = vld [vmem:[%s4907_s3 + $0x1d4] sm:$0xf0]  ;;  %v3217_v40 = vld [vmem:[%s4907_s3 + $0x1d4] sm:$0xf]  ;;  %v4238_v15 = vld [vmem:[%s3832_s20 + $0xc] sm:$0xff] }
  0x58   : > { %1376 = vmatpush.bf16.msra.mxu0 %v2812_v1  ;;  %v843_v32 = vrot.slane %v842_v27, 4  ;;  %v2876_v44 = vor.u32 %v3218_v39, %v2875_v38  ;;  %v2877_v45 = vld [vmem:[%s4907_s3 + $0x1d8] sm:$0xf0]  ;;  %v2795_v46 = vld [vmem:[%s4907_s3 + $0x150] sm:$0xf] }
  0x59   : > { %1575 = vmatpush.bf16.msra.mxu2 %v2892_v51  ;;  %1405 = vmatpush.bf16.msra.mxu1 %v2816_v7  ;;  %v853_v33 = vrot.slane %v852_v28, 4  ;;  %v857_v37 = vrot.slane %v855_v31, 5  ;;  %v3202_v47 = vld [vmem:[%s4907_s3 + $0x154] sm:$0xf0]  ;;  %v2880_v50 = vor.u32 %v3217_v40, %v2877_v45  ;;  %v3201_v52 = vld [vmem:[%s4907_s3 + $0x154] sm:$0xf] }
  0x5a   : > { %1604 = vmatpush.bf16.msra.mxu3 %v2896_v57  ;;  %v2796_v51 = vor.u32 %v3202_v47, %v2795_v46  ;;  %v2797_v56 = vld [vmem:[%s4907_s3 + $0x158] sm:$0xf0]  ;;  %v2867_v57 = vld [vmem:[%s4907_s3 + $0x1c0] sm:$0xf]  ;;  %v848_v58 = vsel %vm3900_vm2, %v843_v32, %v847_v22  ;;  %v3216_v61 = vld [vmem:[%s4907_s3 + $0x1c4] sm:$0xf0] }
  0x5b   : > { %v2800_v59 = vor.u32 %v3201_v52, %v2797_v56  ;;  %v3215_v62 = vld [vmem:[%s4907_s3 + $0x1c4] sm:$0xf]  ;;  %v2869_v0 = vld [vmem:[%s4907_s3 + $0x1c8] sm:$0xf0]  ;;  %v858_v1 = vsel %vm3900_vm2, %v853_v33, %v857_v37  ;;  %v2868_v2 = vor.u32 %v3216_v61, %v2867_v57  ;;  %v2787_v6 = vld [vmem:[%s4907_s3 + $0x140] sm:$0xf] }
  0x5c   : > { %1377 = vmatpush.bf16.msra.mxu0 %v2804_v18  ;;  %v2872_v3 = vor.u32 %v3215_v62, %v2869_v0  ;;  %v3200_v7 = vld [vmem:[%s4907_s3 + $0x144] sm:$0xf0]  ;;  %v2789_v10 = vld [vmem:[%s4907_s3 + $0x148] sm:$0xf0]  ;;  %v876_v13 = vunpack.c.l.b16 %v858_v1  ;;  %v2859_v16 = vld [vmem:[%s4907_s3 + $0x1b0] sm:$0xf] }
  0x5d   : > { %1576 = vmatpush.bf16.msra.mxu2 %v2884_v8  ;;  %1406 = vmatpush.bf16.msra.mxu1 %v2808_v19  ;;  %v3199_v8 = vld [vmem:[%s4907_s3 + $0x144] sm:$0xf]  ;;  %v2788_v9 = vor.u32 %v3200_v7, %v2787_v6  ;;  %v3214_v17 = vld [vmem:[%s4907_s3 + $0x1b4] sm:$0xf0]  ;;  %v3213_v18 = vld [vmem:[%s4907_s3 + $0x1b4] sm:$0xf] }
  0x5e   : > { %1605 = vmatpush.bf16.msra.mxu3 %v2888_v12  ;;  %v2792_v11 = vor.u32 %v3199_v8, %v2789_v10  ;;  %v875_v12 = vunpack.c.l.b16 %v848_v58  ;;  %v2860_v19 = vor.u32 %v3214_v17, %v2859_v16  ;;  %v2861_v20 = vld [vmem:[%s4907_s3 + $0x1b8] sm:$0xf0]  ;;  %v2779_v21 = vld [vmem:[%s4907_s3 + $0x130] sm:$0xf]  ;;  %v3198_v22 = vld [vmem:[%s4907_s3 + $0x134] sm:$0xf0] }
  0x5f   : > { %v2864_v24 = vor.u32 %v3213_v18, %v2861_v20  ;;  %v2780_v27 = vor.u32 %v3198_v22, %v2779_v21  ;;  %v3197_v28 = vld [vmem:[%s4907_s3 + $0x134] sm:$0xf]  ;;  %v2781_v31 = vld [vmem:[%s4907_s3 + $0x138] sm:$0xf0]  ;;  %v2851_v32 = vld [vmem:[%s4907_s3 + $0x1a0] sm:$0xf] }
  0x60   : > { %1378 = vmatpush.bf16.msra.mxu0 %v2796_v51  ;;  %v877_v14 = vpack.c.b16 %v876_v13, %v875_v12  ;;  %v2784_v33 = vor.u32 %v3197_v28, %v2781_v31  ;;  %v3212_v37 = vld [vmem:[%s4907_s3 + $0x1a4] sm:$0xf0]  ;;  %v3211_v38 = vld [vmem:[%s4907_s3 + $0x1a4] sm:$0xf]  ;;  %v2853_v39 = vld [vmem:[%s4907_s3 + $0x1a8] sm:$0xf0] }
  0x61   : > { %1577 = vmatpush.bf16.msra.mxu2 %v2876_v44  ;;  %1407 = vmatpush.bf16.msra.mxu1 %v2800_v59  ;;  %v2852_v40 = vor.u32 %v3212_v37, %v2851_v32  ;;  %v2856_v44 = vor.u32 %v3211_v38, %v2853_v39  ;;  %v2771_v45 = vld [vmem:[%s4907_s3 + $0x120] sm:$0xf]  ;;  %v3196_v46 = vld [vmem:[%s4907_s3 + $0x124] sm:$0xf0]  ;;  %v3195_v47 = vld [vmem:[%s4907_s3 + $0x124] sm:$0xf] }
  0x62   : > { %705 = vmatmul.bf16.gmra.mxu0 %v4106_v30  ;;  %1606 = vmatpush.bf16.msra.mxu3 %v2880_v50  ;;  %v2772_v50 = vor.u32 %v3196_v46, %v2771_v45  ;;  %v2773_v51 = vld [vmem:[%s4907_s3 + $0x128] sm:$0xf0]  ;;  %v4291_v56 = vld [vmem:[%s3832_s20 + $0x18] sm:$0xff]  ;;  %v2843_v57 = vld [vmem:[%s4907_s3 + $0x190] sm:$0xf]  ;;  %v1237_v37 = vrot.slane %v3851_v54, 5 }
  0x63   : > { %734 = vmatmul.bf16.gmra.mxu1 %v4106_v30  ;;  %763 = vmatmul.bf16.gmra.mxu2 %v4106_v30  ;;  %v2776_v52 = vor.u32 %v3195_v47, %v2773_v51  ;;  %v3210_v58 = vld [vmem:[%s4907_s3 + $0x194] sm:$0xf0]  ;;  %v3209_v59 = vld [vmem:[%s4907_s3 + $0x194] sm:$0xf]  ;;  %v2763_v62 = vld [vmem:[%s4907_s3 + $0x110] sm:$0xf] }
  0x64   : > { %792 = vmatmul.bf16.gmra.mxu3 %v4106_v30  ;;  %1379 = vmatpush.bf16.msra.mxu0 %v2788_v9  ;;  %v2844_v61 = vor.u32 %v3210_v58, %v2843_v57  ;;  %v3194_v0 = vld [vmem:[%s4907_s3 + $0x114] sm:$0xf0]  ;;  %v2765_v6 = vld [vmem:[%s4907_s3 + $0x118] sm:$0xf0]  ;;  %v2835_v7 = vld [vmem:[%s4907_s3 + $0x180] sm:$0xf] }
  0x65   : > { %1578 = vmatpush.bf16.msra.mxu2 %v2868_v2  ;;  %1408 = vmatpush.bf16.msra.mxu1 %v2792_v11  ;;  %v2764_v2 = vor.u32 %v3194_v0, %v2763_v62  ;;  %v3208_v9 = vld [vmem:[%s4907_s3 + $0x184] sm:$0xf0]  ;;  %v3207_v10 = vld [vmem:[%s4907_s3 + $0x184] sm:$0xf]  ;;  %v2837_v11 = vld [vmem:[%s4907_s3 + $0x188] sm:$0xf0] }
  0x66   : > { %1607 = vmatpush.bf16.msra.mxu3 %v2872_v3  ;;  %v3193_v3 = vld [vmem:[%s4907_s3 + $0x114] sm:$0xf]  ;;  %v2836_v12 = vor.u32 %v3208_v9, %v2835_v7  ;;  %v2840_v13 = vor.u32 %v3207_v10, %v2837_v11  ;;  %v3192_v16 = vld [vmem:[%s4907_s3 + $0x104] sm:$0xf0]  ;;  %v3191_v17 = vld [vmem:[%s4907_s3 + $0x104] sm:$0xf] }
  0x67   : > { %v2768_v8 = vor.u32 %v3193_v3, %v2765_v6  ;;  %v4346_v20 = vld [vmem:[%s3832_s20 + $0x24] sm:$0xff]  ;;  %v3246_v22 = vld [vmem:[%s4906_s2 + $0xb8] sm:$0xff]  ;;  %v3245_v31 = vld [vmem:[%s4906_s2 + $0xb0] sm:$0xff]  ;;  %v2733_v54 = vrot.slane %v3848_v53, 9  ;;  %v1244_v0 = vrot.slane %v3875_v4, 5  ;;  %v2734_v3 = vrot.slane %v3865_v63, 9 }
  0x68   : > { %1380 = vmatpush.bf16.msra.mxu0 %v2780_v27  ;;  %v3230_v27 = vld [vmem:[%s4906_s2 + $0x38] sm:$0xff]  ;;  %v3253_v32 = vld [vmem:[%s4906_s2 + $0xf0] sm:$0xff]  ;;  %v3244_v45 = vld [vmem:[%s4906_s2 + $0xa8] sm:$0xff]  ;;  %v1247_v4 = vrot.slane %v3878_v5, 5 }
  0x69   : > { %1579 = vmatpush.bf16.msra.mxu2 %v2860_v19  ;;  %1409 = vmatpush.bf16.msra.mxu1 %v2784_v33  ;;  %v2757_v19 = vld [vmem:[%s4907_s3 + $0x108] sm:$0xf0]  ;;  %v3238_v28 = vld [vmem:[%s4906_s2 + $0x78] sm:$0xff]  ;;  %v4371_v33 = vld [vmem:[%s4032_s7] sm:$0xff]  ;;  %v1238_v53 = vsel %vm4392_vm5, %v2733_v54, %v1237_v37  ;;  %v1246_v6 = vrot.slane %v1244_v0, 4  ;;  %v1245_v5 = vsel %vm4392_vm5, %v2734_v3, %v1244_v0  ;;  %v2933_v0 = vrot.slane %v4110_v34, 9 }
  0x6a   : > { %1608 = vmatpush.bf16.msra.mxu3 %v2864_v24  ;;  %v2760_v21 = vor.u32 %v3191_v17, %v2757_v19  ;;  %v3254_v24 = vld [vmem:[%s4906_s2 + $0xf8] sm:$0xff]  ;;  %v3229_v38 = vld [vmem:[%s4906_s2 + $0x30] sm:$0xff]  ;;  %v3252_v46 = vld [vmem:[%s4906_s2 + $0xe8] sm:$0xff]  ;;  %v1280_v58 = vunpack.c.l.b16 %v1238_v53  ;;  %v1282_v17 = vunpack.c.l.b16 %v1245_v5  ;;  %v1762_v3 = vrot.slane %v4176_v25, 5 }
  0x6b   : > { %v3237_v39 = vld [vmem:[%s4906_s2 + $0x70] sm:$0xff]  ;;  %v3236_v51 = vld [vmem:[%s4906_s2 + $0x68] sm:$0xff]  ;;  %v3251_v57 = vld [vmem:[%s4906_s2 + $0xe0] sm:$0xff]  ;;  %v1248_v11 = vsel %vm4392_vm5, %v1246_v6, %v1247_v4 }
  0x6c   : > { %1381 = vmatpush.bf16.msra.mxu0 %v2772_v50  ;;  %v3228_v50 = vld [vmem:[%s4906_s2 + $0x28] sm:$0xff]  ;;  %v3242_v7 = vld [vmem:[%s4906_s2 + $0x98] sm:$0xff]  ;;  %v3223_v25 = vld [vmem:[%s4906_s2] sm:$0xff] }
  0x6d   : > { %1580 = vmatpush.bf16.msra.mxu2 %v2852_v40  ;;  %1410 = vmatpush.bf16.msra.mxu1 %v2776_v52  ;;  %v1239_v40 = vrot.slane %v1237_v37, 4  ;;  %v3243_v52 = vld [vmem:[%s4906_s2 + $0xa0] sm:$0xff]  ;;  %v2735_v37 = vrot.slane %v3952_v48, 9  ;;  %v3248_v54 = vld [vmem:[%s4906_s2 + $0xc8] sm:$0xff]  ;;  %v1759_v48 = vrot.slane %v4113_v35, 5 }
  0x6e   : > { %1609 = vmatpush.bf16.msra.mxu3 %v2856_v44  ;;  %v1240_v44 = vrot.slane %v3854_v55, 5 }
  0x70   : > { %1382 = vmatpush.bf16.msra.mxu0 %v2764_v2  ;;  %v1241_v55 = vsel %vm4392_vm5, %v1239_v40, %v1240_v44  ;;  %v3235_v2 = vld [vmem:[%s4906_s2 + $0x60] sm:$0xff]  ;;  %v4491_v40 = vld [vmem:[%s4032_s7 + $0xc] sm:$0xf]  ;;  %v4494_v44 = vld [vmem:[%s4032_s7 + $0x10] sm:$0xf] }
  0x71   : > { %1581 = vmatpush.bf16.msra.mxu2 %v2844_v61  ;;  %1411 = vmatpush.bf16.msra.mxu1 %v2768_v8  ;;  %v3250_v8 = vld [vmem:[%s4906_s2 + $0xd8] sm:$0xff]  ;;  %v1460_v35 = vshll.u32 %v4494_v44, 16 }
  0x72   : > { %710 = vmatmul.bf16.gmra.mxu0 %v4178_v26 }
  0x73   : > { %739 = vmatmul.bf16.gmra.mxu1 %v4178_v26  ;;  %768 = vmatmul.bf16.gmra.mxu2 %v4178_v26  ;;  %v1462_v5 = vrot.slane %v1460_v35, 5 }
  0x74   : > { %797 = vmatmul.bf16.gmra.mxu3 %v4178_v26 }
  0x75   : > { %1582 = vmatpush.bf16.msra.mxu2 %v2836_v12  ;;  %1412 = vmatpush.bf16.msra.mxu1 %v2760_v21  ;;  %v3226_v12 = vld [vmem:[%s4906_s2 + $0x18] sm:$0xff] }
  0x82   : > { %967 = vmatmul.bf16.vlgmr.msrb.gmra.mxu0 %v877_v14 }
  0x83   : > { %996 = vmatmul.bf16.vlgmr.msrb.gmra.mxu1 %v877_v14  ;;  %1162 = vmatmul.bf16.vlgmr.msrb.gmra.mxu2 %v4238_v15  ;;  %v2755_v14 = vld [vmem:[%s4907_s3 + $0x100] sm:$0xf] }
  0x84   : > { %1191 = vmatmul.bf16.vlgmr.msrb.gmra.mxu3 %v4238_v15  ;;  %v2756_v18 = vor.u32 %v3192_v16, %v2755_v14  ;;  %1941 = vmatpush.bf16.msrb.mxu2 %v3246_v22  ;;  %v3241_v14 = vld [vmem:[%s4906_s2 + $0x90] sm:$0xff] }
  0x85   : > { %1833 = vmatpush.bf16.msrb.mxu1 %v3238_v28  ;;  %v3249_v16 = vld [vmem:[%s4906_s2 + $0xd0] sm:$0xff]  ;;  %v1251_v28 = vrot.slane %v3959_v60, 5  ;;  %v1254_v60 = vrot.slane %v4027_v36, 5 }
  0x86   : > { %1383 = vmatpush.bf16.msra.mxu0 %v2756_v18  ;;  %v1283_v18 = vunpack.c.l.b16 %v1248_v11 }
  0x87   : > { %v1252_v53 = vsel %vm4392_vm5, %v2735_v37, %v1251_v28 }
  0x88   : > { %1942 = vmatpush.bf16.msrb.mxu2 %v3245_v31  ;;  %v4465_v22 = vpack.c.b16 %v1283_v18, %v1282_v17  ;;  %v3225_v31 = vld [vmem:[%s4906_s2 + $0x10] sm:$0xff]  ;;  %v1284_v6 = vunpack.c.l.b16 %v1252_v53  ;;  %v1760_v17 = vsel %vm4392_vm5, %v2933_v0, %v1759_v48 }
  0x89   : > { %1834 = vmatpush.bf16.msrb.mxu1 %v3237_v39  ;;  %v3240_v39 = vld [vmem:[%s4906_s2 + $0x88] sm:$0xff]  ;;  %v1781_v37 = vunpack.c.l.b16 %v1760_v17 }
  0x8a   : > { %1719 = vmatpush.bf16.msrb.mxu0 %v3230_v27 }
  0x8c   : > { %1943 = vmatpush.bf16.msrb.mxu2 %v3244_v45 }
  0x8d   : > { %1835 = vmatpush.bf16.msrb.mxu1 %v3236_v51  ;;  %v1454_v51 = vshll.u32 %v4491_v40, 16 }
  0x8e   : > { %1720 = vmatpush.bf16.msrb.mxu0 %v3229_v38  ;;  %v1253_v38 = vrot.slane %v1251_v28, 4 }
  0x90   : > { %1944 = vmatpush.bf16.msrb.mxu2 %v3243_v52  ;;  %v1464_v52 = vshrl.u32 %v4494_v44, 16 }
  0x91   : > { %1836 = vmatpush.bf16.msrb.mxu1 %v3235_v2  ;;  %v1761_v2 = vrot.slane %v1759_v48, 4  ;;  %v2736_v48 = vrot.slane %v4038_v42, 9 }
  0x92   : > { %972 = vmatmul.bf16.gmra.mxu0 %v3954_v49  ;;  %v1466_v11 = vrot.slane %v1464_v52, 4 }
  0x93   : > { %1001 = vmatmul.bf16.gmra.mxu1 %v3954_v49  ;;  %1167 = vmatmul.bf16.gmra.mxu2 %v4291_v56  ;;  %v2845_v49 = vld [vmem:[%s4907_s3 + $0x198] sm:$0xf0]  ;;  %v1763_v18 = vsel %vm4392_vm5, %v1761_v2, %v1762_v3 }
  0x94   : > { %1196 = vmatmul.bf16.gmra.mxu3 %v4291_v56  ;;  %v2848_v1 = vor.u32 %v3209_v59, %v2845_v49  ;;  %v1281_v59 = vunpack.c.l.b16 %v1241_v55  ;;  %1721 = vmatpush.bf16.msrb.mxu0 %v3228_v50  ;;  %v1255_v55 = vsel %vm4392_vm5, %v1253_v38, %v1254_v60  ;;  %v1451_v50 = vshrl.u32 %v4491_v40, 16 }
  0x95   : > { %1945 = vmatpush.bf16.msrb.mxu2 %v3242_v7  ;;  %v1285_v4 = vunpack.c.l.b16 %v1255_v55  ;;  %v1782_v38 = vunpack.c.l.b16 %v1763_v18  ;;  %v1261_v55 = vrot.slane %v4104_v29, 5 }
  0x96   : > { %1610 = vmatpush.bf16.msra.mxu3 %v2848_v1  ;;  %v4412_v61 = vpack.c.b16 %v1281_v59, %v1280_v58  ;;  %v3227_v1 = vld [vmem:[%s4906_s2 + $0x20] sm:$0xff]  ;;  %v3232_v58 = vld [vmem:[%s4906_s2 + $0x48] sm:$0xff]  ;;  %v1453_v7 = vrot.slane %v1451_v50, 4 }
  0x97   : > { %v3239_v59 = vld [vmem:[%s4906_s2 + $0x80] sm:$0xff]  ;;  %v1783_v53 = vpack.c.b16 %v1782_v38, %v1781_v37 }
  0x98   : > { %1722 = vmatpush.bf16.msrb.mxu0 %v3227_v1  ;;  %v3247_v1 = vld [vmem:[%s4906_s2 + $0xc0] sm:$0xff] }
  0x99   : > { %1946 = vmatpush.bf16.msrb.mxu2 %v3241_v14  ;;  %v4534_v14 = vpack.c.b16 %v1285_v4, %v1284_v6 }
  0x9a   : > { %1611 = vmatpush.bf16.msra.mxu3 %v2840_v13  ;;  %v3234_v13 = vld [vmem:[%s4906_s2 + $0x58] sm:$0xff] }
  0x9b   : > { %1837 = vmatpush.bf16.msrb.mxu1 %v3234_v13 }
  0x9c   : > { %1723 = vmatpush.bf16.msrb.mxu0 %v3226_v12  ;;  %v4528_v12 = vld [vmem:[%s4032_s7 + $0x14] sm:$0xf] }
  0x9d   : > { %1947 = vmatpush.bf16.msrb.mxu2 %v3240_v39  ;;  %v1467_v39 = vor.u32 %v1466_v11, %v1462_v5 }
  0x9e   : > { %2055 = vmatpush.bf16.msrb.mxu3 %v3254_v24 }
  0xa0   : > { %1724 = vmatpush.bf16.msrb.mxu0 %v3225_v31 }
  0xa1   : > { %1948 = vmatpush.bf16.msrb.mxu2 %v3239_v59 }
  0xa2   : > { %977 = vmatmul.bf16.gmra.mxu0 %v4035_v41  ;;  %2056 = vmatpush.bf16.msrb.mxu3 %v3253_v32  ;;  %v3233_v32 = vld [vmem:[%s4906_s2 + $0x50] sm:$0xff] }
  0xa3   : > { %1006 = vmatmul.bf16.gmra.mxu1 %v4035_v41  ;;  %1172 = vmatmul.bf16.gmra.mxu2 %v4346_v20 }
  0xa4   : > { %1201 = vmatmul.bf16.gmra.mxu3 %v4346_v20  ;;  %1838 = vmatpush.bf16.msrb.mxu1 %v3233_v32  ;;  %v1258_v32 = vrot.slane %v4041_v43, 5 }
  0xa6   : > { %2057 = vmatpush.bf16.msrb.mxu3 %v3252_v46  ;;  %v1260_v43 = vrot.slane %v1258_v32, 4  ;;  %v1259_v0 = vsel %vm4392_vm5, %v2736_v48, %v1258_v32  ;;  %v4597_v32 = vld [vmem:[%s4909_s5] ss:$0 sm:$0xff] }
  0xa8   : > { %1839 = vmatpush.bf16.msrb.mxu1 %v3232_v58  ;;  %v1262_v42 = vsel %vm4392_vm5, %v1260_v43, %v1261_v55 }
  0xa9   : > { %v1287_v2 = vunpack.c.l.b16 %v1262_v42 }
  0xaa   : > { %2058 = vmatpush.bf16.msrb.mxu3 %v3251_v57  ;;  %v3224_v57 = vld [vmem:[%s4906_s2 + $0x8] sm:$0xff] }
  0xab   : > { %1725 = vmatpush.bf16.msrb.mxu0 %v3224_v57 }
  0xae   : > { %2059 = vmatpush.bf16.msrb.mxu3 %v3250_v8  ;;  %v1456_v8 = vrot.slane %v1454_v51, 5  ;;  %v1468_v51 = vrot.slane %v1467_v39, 4 }
  0xaf   : > { %1726 = vmatpush.bf16.msrb.mxu0 %v3223_v25 }
  0xb0   : > { %v1457_v60 = vor.u32 %v1456_v8, %v1453_v7 }
  0xb2   : > { %982 = vmatmul.bf16.gmra.mxu0 %v4106_v30  ;;  %2060 = vmatpush.bf16.msrb.mxu3 %v3249_v16  ;;  %v3231_v16 = vld [vmem:[%s4906_s2 + $0x40] sm:$0xff]  ;;  %v1458_v50 = vrot.slane %v1457_v60, 4 }
  0xb3   : > { %1011 = vmatmul.bf16.gmra.mxu1 %v4106_v30  ;;  %1177 = vmatmul.bf16.gmra.mxu2 %v4371_v33 }
  0xb4   : > { %1206 = vmatmul.bf16.gmra.mxu3 %v4371_v33  ;;  %1840 = vmatpush.bf16.msrb.mxu1 %v3231_v16  ;;  %v1463_v29 = vsel %vm3900_vm2, %v1458_v50, %v1462_v5 }
  0xb5   : > { %v1491_v3 = vunpack.c.l.b16 %v1463_v29 }
  0xb6   : > { %2061 = vmatpush.bf16.msrb.mxu3 %v3248_v54  ;;  %v1470_v54 = vshll.u32 %v4528_v12, 16 }
  0xb8   : > { %v1472_v35 = vrot.slane %v1470_v54, 5  ;;  %v3121_v54 = vld [vmem:[%s3832_s20] sm:$0xff]  ;;  %s318_s20 = sand.u32 1, %s3443_s21   ;;  %s3255_s21 = sshll.u32 (%p3550_p5), %s3451_s23, 3 }
  0xb9   : > { %s2169_s10 = sadd.s32 (%p3550_p5), %s3255_s21, %s3110_s14 }
  0xba   : > { %2062 = vmatpush.bf16.msrb.mxu3 %v3247_v1  ;;  %v1286_v1 = vunpack.c.l.b16 %v1259_v0  ;;  %s3111_s30 = sshll.u32 (%p3550_p5), %s2169_s10, 2 }
  0xbb   : > { %s2171_s9 = scalar_lea.vmem (%p3550_p5), %s4910_s6, %s3111_s30 }
  0xbc   : > { %v4578_v8 = vpack.c.b16 %v1287_v2, %v1286_v1 }
  0xbf   : > { %v4414_v49 = vpop.f32.mrf.mxu0 }
  0xc0   : > { %v4416_v62 = vpop.f32.mrf.mxu1  ;;  %v803_v37 = vadd.f32 %v4597_v32, %v4414_v49 }
  0xc1   : > { %v811_v38 = vadd.f32 %v4597_v32, %v4416_v62 }
  0xc2   : > { %1384 = vmatmul.bf16.vlgmr.msra.gmra.mxu0 %v4412_v61 }
  0xc3   : > { %1413 = vmatmul.bf16.vlgmr.msra.gmra.mxu1 %v4412_v61  ;;  %1583 = vmatmul.bf16.vlgmr.msra.gmra.mxu2 %v4035_v41 }
  0xc4   : > { %1612 = vmatmul.bf16.vlgmr.msra.gmra.mxu3 %v4035_v41 }
  0xc6   : > { %v4437_v9 = vpop.f32.mrf.mxu2 }
  0xc7   : > { %v4439_v41 = vpop.f32.mrf.mxu3  ;;  %v4441_v63 = vpop.f32.mrf.mxu0  ;;  %v819_v49 = vadd.f32 %v4597_v32, %v4437_v9 }
  0xc8   : > { %v4443_v10 = vpop.f32.mrf.mxu1  ;;  %v804_v62 = vadd.f32 %v4597_v32, %v4441_v63 }
  0xce   : > { %v4461_v19 = vpop.f32.mrf.mxu2 }
  0xcf   : > { %v4463_v21 = vpop.f32.mrf.mxu3  ;;  %v4467_v24 = vpop.f32.mrf.mxu0  ;;  %v820_v9 = vadd.f32 %v4597_v32, %v4461_v19 }
  0xd0   : > { %v4469_v27 = vpop.f32.mrf.mxu1  ;;  %v805_v63 = vadd.f32 %v4597_v32, %v4467_v24 }
  0xd2   : > { %1389 = vmatmul.bf16.gmra.mxu0 %v4465_v22 }
  0xd3   : > { %1418 = vmatmul.bf16.gmra.mxu1 %v4465_v22  ;;  %1588 = vmatmul.bf16.gmra.mxu2 %v4106_v30 }
  0xd4   : > { %1617 = vmatmul.bf16.gmra.mxu3 %v4106_v30 }
  0xd6   : > { %v4497_v30 = vpop.f32.mrf.mxu2 }
  0xd7   : > { %v4499_v36 = vpop.f32.mrf.mxu3  ;;  %v4501_v45 = vpop.f32.mrf.mxu0  ;;  %v821_v19 = vadd.f32 %v4597_v32, %v4497_v30 }
  0xd8   : > { %v4503_v46 = vpop.f32.mrf.mxu1  ;;  %v806_v24 = vadd.f32 %v4597_v32, %v4501_v45 }
  0xde   : > { %v4530_v34 = vpop.f32.mrf.mxu2 }
  0xdf   : > { %v4532_v13 = vpop.f32.mrf.mxu3  ;;  %v4546_v28 = vpop.f32.mrf.mxu0  ;;  %v822_v30 = vadd.f32 %v4597_v32, %v4530_v34  ;;  %v3034_v34 = vrot.slane %v4491_v40, 9 }
  0xe0   : > { %v4548_v31 = vpop.f32.mrf.mxu1  ;;  %v807_v45 = vadd.f32 %v4597_v32, %v4546_v28 }
  0xe2   : > { %1394 = vmatmul.bf16.gmra.mxu0 %v4534_v14 }
  0xe3   : > { %1423 = vmatmul.bf16.gmra.mxu1 %v4534_v14  ;;  %1593 = vmatmul.bf16.gmra.mxu2 %v4178_v26 }
  0xe4   : > { %1622 = vmatmul.bf16.gmra.mxu3 %v4178_v26  ;;  %v1473_v26 = vsel %vm3900_vm2, %v1468_v51, %v1472_v35  ;;  %v812_v51 = vadd.f32 %v4597_v32, %v4443_v10  ;;  %v813_v10 = vadd.f32 %v4597_v32, %v4469_v27  ;;  %v814_v27 = vadd.f32 %v4597_v32, %v4503_v46 }
  0xe5   : > { %v1492_v6 = vunpack.c.l.b16 %v1473_v26  ;;  %v815_v46 = vadd.f32 %v4597_v32, %v4548_v31  ;;  %v1984_v31 = vrot.slane %v4528_v12, 5 }
  0xe6   : > { %v4558_v52 = vpop.f32.mrf.mxu2 }
  0xe7   : > { %v4560_v57 = vpop.f32.mrf.mxu3  ;;  %v4562_v58 = vpop.f32.mrf.mxu0  ;;  %v1493_v16 = vpack.c.b16 %v1492_v6, %v1491_v3 }
  0xe8   : > { %v4564_v59 = vpop.f32.mrf.mxu1 }
  0xee   : > { %v4574_v4 = vpop.f32.mrf.mxu2 }
  0xef   : > { %v4576_v7 = vpop.f32.mrf.mxu3  ;;  %v4580_v11 = vpop.f32.mrf.mxu0 }
  0xf0   : > { %v4582_v25 = vpop.f32.mrf.mxu1 }
  0xf2   : > { %1399 = vmatmul.bf16.gmra.mxu0 %v4578_v8 }
  0xf3   : > { %1428 = vmatmul.bf16.gmra.mxu1 %v4578_v8  ;;  %1598 = vmatmul.bf16.gmra.mxu2 %v1493_v16 }
  0xf4   : > { %1627 = vmatmul.bf16.gmra.mxu3 %v1493_v16 }
  0xf6   : > { %v4586_v23 = vpop.f32.mrf.mxu2 }
  0xf7   : > { %v4588_v5 = vpop.f32.mrf.mxu3  ;;  %v4590_v17 = vpop.f32.mrf.mxu0 }
  0xf8   : > { %v4592_v18 = vpop.f32.mrf.mxu1 }
  0xfe   : > { %v4603_v60 = vpop.f32.mrf.mxu2 }
  0xff   : > { %v4605_v39 = vpop.f32.mrf.mxu3  ;;  %v968_v48 = vpop.f32.mrf.mxu0 }
 0x100   : > { %v997_v43 = vpop.f32.mrf.mxu1  ;;  %v1017_v55 = vadd.f32 %v968_v48, %v803_v37 }
 0x101   : > { %v4608_v50 = vadd.f32 %v997_v43, %v811_v38 }
 0x102   : > { %1727 = vmatmul.bf16.vlgmr.msrb.gmra.mxu0 %v3121_v54 }
 0x103   : > { %1841 = vmatmul.bf16.vlgmr.msrb.gmra.mxu1 %v1783_v53  ;;  %1949 = vmatmul.bf16.vlgmr.msrb.gmra.mxu2 %v4291_v56 }
 0x104   : > { %2063 = vmatmul.bf16.vlgmr.msrb.gmra.mxu3 %v4465_v22 }
 0x106   : > { %v1163_v35 = vpop.f32.mrf.mxu2 }
 0x107   : > { %v1192_v0 = vpop.f32.mrf.mxu3  ;;  %v4618_v42 = vadd.f32 %v1163_v35, %v1017_v55  ;;  %v970_v53 = vpop.f32.mrf.mxu0 }
 0x108   : > { %v4620_v29 = vadd.f32 %v1192_v0, %v819_v49  ;;  %v999_v26 = vpop.f32.mrf.mxu1  ;;  %v1018_v1 = vadd.f32 %v970_v53, %v804_v62 }
 0x109   : > { %v4622_v2 = vadd.f32 %v999_v26, %v812_v51 }
 0x10e   : > { %v1165_v3 = vpop.f32.mrf.mxu2 }
 0x10f   : > { %v1194_v6 = vpop.f32.mrf.mxu3  ;;  %v4630_v16 = vadd.f32 %v1165_v3, %v1018_v1  ;;  %v973_v38 = vpop.f32.mrf.mxu0 }
 0x110   : > { %v4632_v37 = vadd.f32 %v1194_v6, %v820_v9  ;;  %v1002_v54 = vpop.f32.mrf.mxu1  ;;  %v1019_v48 = vadd.f32 %v973_v38, %v805_v63  ;;  %v1981_v38 = vrot.slane %v4494_v44, 5 }
 0x111   : > { %v4634_v43 = vadd.f32 %v1002_v54, %v813_v10  ;;  %v823_v54 = vadd.f32 %v4597_v32, %v4558_v52 }
 0x112   : > { %1732 = vmatmul.bf16.gmra.mxu0 %v4238_v15  ;;  %v1983_v28 = vrot.slane %v1981_v38, 4  ;;  %v1982_v52 = vsel %vm4392_vm5, %v3034_v34, %v1981_v38 }
 0x113   : > { %1846 = vmatmul.bf16.gmra.mxu1 %v4412_v61  ;;  %1954 = vmatmul.bf16.gmra.mxu2 %v4346_v20 }
 0x114   : > { %2068 = vmatmul.bf16.gmra.mxu3 %v4534_v14 }
 0x116   : > { %v1168_v55 = vpop.f32.mrf.mxu2 }
 0x117   : > { %v1197_v49 = vpop.f32.mrf.mxu3  ;;  %v4646_v62 = vadd.f32 %v1168_v55, %v1019_v48  ;;  %v975_v61 = vpop.f32.mrf.mxu0  ;;  %v808_v48 = vadd.f32 %v4597_v32, %v4562_v58  ;;  %v1985_v58 = vsel %vm4392_vm5, %v1983_v28, %v1984_v31  ;;  %v824_v55 = vadd.f32 %v4597_v32, %v4574_v4 }
 0x118   : > { %v4648_v15 = vadd.f32 %v1197_v49, %v821_v19  ;;  %v1004_v51 = vpop.f32.mrf.mxu1  ;;  %v1020_v35 = vadd.f32 %v975_v61, %v806_v24  ;;  %v809_v49 = vadd.f32 %v4597_v32, %v4580_v11  ;;  %v817_v61 = vadd.f32 %v4597_v32, %v4582_v25 }
 0x119   : > { %v4650_v0 = vadd.f32 %v1004_v51, %v814_v27  ;;  %v2003_v27 = vunpack.c.l.b16 %v1982_v52  ;;  %v825_v4 = vadd.f32 %v4597_v32, %v4586_v23  ;;  %v810_v11 = vadd.f32 %v4597_v32, %v4590_v17 }
 0x11a   : > { %v818_v25 = vadd.f32 %v4597_v32, %v4592_v18  ;;  %v826_v23 = vadd.f32 %v4597_v32, %v4603_v60  ;;  %v827_v17 = vadd.f32 %v4597_v32, %v4439_v41  ;;  %v828_v52 = vadd.f32 %v4597_v32, %v4463_v21 }
 0x11e   : > { %v1170_v53 = vpop.f32.mrf.mxu2 }
 0x11f   : > { %v1199_v26 = vpop.f32.mrf.mxu3  ;;  %v4658_v1 = vadd.f32 %v1170_v53, %v1020_v35  ;;  %v978_v63 = vpop.f32.mrf.mxu0  ;;  %v3126_v53 = vld [vmem:[%s4032_s7 + $0xc] sm:$0xff]  ;;  %s2439_s7 = sshll.u32 %s318_s20, 7 }
 0x120   : > { %v4660_v9 = vadd.f32 %v1199_v26, %v822_v30  ;;  %v1007_v10 = vpop.f32.mrf.mxu1  ;;  %v1021_v3 = vadd.f32 %v978_v63, %v807_v45  ;;  %s4803_s13 = scalar_lea.vmem [#allocation2], %s2439_s7 }
 0x121   : > { %v4662_v6 = vadd.f32 %v1007_v10, %v815_v46 }
 0x122   : > { %1737 = vmatmul.bf16.gmra.mxu0 %v4291_v56  ;;  %v816_v56 = vadd.f32 %v4597_v32, %v4564_v59  ;;  %v2004_v59 = vunpack.c.l.b16 %v1985_v58 }
 0x123   : > { %1851 = vmatmul.bf16.gmra.mxu1 %v4465_v22  ;;  %1959 = vmatmul.bf16.gmra.mxu2 %v4371_v33 }
 0x124   : > { %2073 = vmatmul.bf16.gmra.mxu3 %v4578_v8  ;;  %v2005_v26 = vpack.c.b16 %v2004_v59, %v2003_v27 }
 0x126   : > { %v1173_v44 = vpop.f32.mrf.mxu2 }
 0x127   : > { %v1202_v22 = vpop.f32.mrf.mxu3  ;;  %v4677_v19 = vadd.f32 %v1173_v44, %v1021_v3  ;;  %v980_v8 = vpop.f32.mrf.mxu0 }
 0x128   : > { %v4679_v33 = vadd.f32 %v1202_v22, %v823_v54  ;;  %v1009_v40 = vpop.f32.mrf.mxu1  ;;  %v1022_v24 = vadd.f32 %v980_v8, %v808_v48 }
 0x129   : > { %v4681_v12 = vadd.f32 %v1009_v40, %v816_v56 }
 0x12e   : > { %v1175_v51 = vpop.f32.mrf.mxu2 }
 0x12f   : > { %v1204_v35 = vpop.f32.mrf.mxu3  ;;  %v4693_v30 = vadd.f32 %v1175_v51, %v1022_v24  ;;  %v983_v46 = vpop.f32.mrf.mxu0 }
 0x130   : > { %v4695_v45 = vadd.f32 %v1204_v35, %v824_v55  ;;  %v1012_v47 = vpop.f32.mrf.mxu1  ;;  %v1023_v63 = vadd.f32 %v983_v46, %v809_v49 }
 0x131   : > { %v4698_v10 = vadd.f32 %v1012_v47, %v817_v61  ;;  %v829_v61 = vadd.f32 %v4597_v32, %v4499_v36  ;;  %v830_v47 = vadd.f32 %v4597_v32, %v4532_v13 }
 0x132   : > { %1742 = vmatmul.bf16.gmra.mxu0 %v4346_v20 }
 0x133   : > { %1856 = vmatmul.bf16.gmra.mxu1 %v4534_v14  ;;  %1964 = vmatmul.bf16.gmra.mxu2 %v3126_v53 }
 0x134   : > { %2078 = vmatmul.bf16.gmra.mxu3 %v2005_v26 }
 0x136   : > { %v1178_v3 = vpop.f32.mrf.mxu2 }
 0x137   : > { %v1207_v38 = vpop.f32.mrf.mxu3  ;;  %v4708_v34 = vadd.f32 %v1178_v3, %v1023_v63  ;;  %v985_v20 = vpop.f32.mrf.mxu0 }
 0x138   : > { %v4710_v28 = vadd.f32 %v1207_v38, %v825_v4  ;;  %v1014_v31 = vpop.f32.mrf.mxu1  ;;  %v1024_v14 = vadd.f32 %v985_v20, %v810_v11 }
 0x139   : > { %v4712_v54 = vadd.f32 %v1014_v31, %v818_v25 }
 0x13e   : > { %v1180_v48 = vpop.f32.mrf.mxu2 }
 0x13f   : > { %v1209_v56 = vpop.f32.mrf.mxu3  ;;  %v4718_v18 = vadd.f32 %v1180_v48, %v1024_v14  ;;  %v1385_v22 = vpop.f32.mrf.mxu0  ;;  %v832_v14 = vadd.f32 %v4597_v32, %v4576_v7 }
 0x140   : > { %v4720_v44 = vadd.f32 %v1209_v56, %v826_v23  ;;  %v1414_v8 = vpop.f32.mrf.mxu1  ;;  %v4723_v40 = vadd.f32 %v1385_v22, %v4608_v50 }
 0x141   : > { %v1442_v24 = vadd.f32 %v1414_v8, %v827_v17 }
 0x146   : > { %v1584_v58 = vpop.f32.mrf.mxu2 }
 0x147   : > { %v1613_v60 = vpop.f32.mrf.mxu3  ;;  %v4728_v27 = vadd.f32 %v1584_v58, %v4620_v29  ;;  %v1387_v59 = vpop.f32.mrf.mxu0 }
 0x148   : > { %v4730_v41 = vadd.f32 %v1613_v60, %v1442_v24  ;;  %v1416_v55 = vpop.f32.mrf.mxu1 }
 0x149   : > { %v4732_v49 = vadd.f32 %v1416_v55, %v828_v52  ;;  %v834_v55 = vadd.f32 %v4597_v32, %v4605_v39 }
 0x14e   : > { %v4736_v50 = vpop.f32.mrf.mxu2 }
 0x14f   : > { %v4738_v51 = vpop.f32.mrf.mxu3  ;;  %v1390_v35 = vpop.f32.mrf.mxu0 }
 0x150   : > { %v1419_v21 = vpop.f32.mrf.mxu1  ;;  %v4741_v46 = vadd.f32 %v1390_v35, %v4634_v43  ;;  %v831_v43 = vadd.f32 %v4597_v32, %v4560_v57 }
 0x151   : > { %v1444_v29 = vadd.f32 %v1419_v21, %v829_v61 }
 0x156   : > { %v1589_v53 = vpop.f32.mrf.mxu2 }
 0x157   : > { %v1618_v26 = vpop.f32.mrf.mxu3  ;;  %v4746_v63 = vadd.f32 %v1589_v53, %v4648_v15  ;;  %v4750_v36 = vpop.f32.mrf.mxu0 }
 0x158   : > { %v4748_v4 = vadd.f32 %v1618_v26, %v1444_v29  ;;  %v1421_v11 = vpop.f32.mrf.mxu1 }
 0x159   : > { %v4752_v25 = vadd.f32 %v1421_v11, %v830_v47 }
 0x15e   : > { %v4756_v3 = vpop.f32.mrf.mxu2 }
 0x15f   : > { %v4758_v38 = vpop.f32.mrf.mxu3  ;;  %v1395_v13 = vpop.f32.mrf.mxu0 }
 0x160   : > { %v1424_v20 = vpop.f32.mrf.mxu1  ;;  %v4761_v31 = vadd.f32 %v1395_v13, %v4662_v6  ;;  %v833_v6 = vadd.f32 %v4597_v32, %v4588_v5  ;;  %v1435_v32 = vadd.f32 %v1387_v59, %v4622_v2  ;;  %v1634_v2 = vadd.f32 %v4736_v50, %v4632_v37 }
 0x161   : > { %v1446_v15 = vadd.f32 %v1424_v20, %v831_v43  ;;  %v1437_v37 = vadd.f32 %v4750_v36, %v4650_v0  ;;  %v1644_v0 = vadd.f32 %v4758_v38, %v4752_v25 }
 0x166   : > { %v1594_v23 = vpop.f32.mrf.mxu2 }
 0x167   : > { %v1623_v17 = vpop.f32.mrf.mxu3  ;;  %v4766_v48 = vadd.f32 %v1594_v23, %v4679_v33  ;;  %v4770_v57 = vpop.f32.mrf.mxu0 }
 0x168   : > { %v4768_v56 = vadd.f32 %v1623_v17, %v1446_v15  ;;  %v1426_v22 = vpop.f32.mrf.mxu1 }
 0x169   : > { %v4772_v8 = vadd.f32 %v1426_v22, %v832_v14 }
 0x16e   : > { %v4776_v24 = vpop.f32.mrf.mxu2 }
 0x16f   : > { %v4778_v52 = vpop.f32.mrf.mxu3  ;;  %v1400_v7 = vpop.f32.mrf.mxu0 }
 0x170   : > { %v1429_v58 = vpop.f32.mrf.mxu1  ;;  %v4781_v33 = vadd.f32 %v1400_v7, %v4698_v10 }
 0x171   : > { %v1448_v60 = vadd.f32 %v1429_v58, %v833_v6 }
 0x176   : > { %v1599_v61 = vpop.f32.mrf.mxu2 }
 0x177   : > { %v1628_v35 = vpop.f32.mrf.mxu3  ;;  %v4786_v21 = vadd.f32 %v1599_v61, %v4710_v28  ;;  %v4790_v29 = vpop.f32.mrf.mxu0 }
 0x178   : > { %v4788_v5 = vadd.f32 %v1628_v35, %v1448_v60  ;;  %v1431_v47 = vpop.f32.mrf.mxu1 }
 0x179   : > { %v4792_v53 = vadd.f32 %v1431_v47, %v834_v55 }
 0x17e   : > { %v4794_v26 = vpop.f32.mrf.mxu2 }
 0x17f   : > { %v4796_v10 = vpop.f32.mrf.mxu3  ;;  %v1728_v11 = vpop.f32.mrf.mxu0 }
 0x180   : > { %v1842_v43 = vpop.f32.mrf.mxu1  ;;  %v1748_v15 = vadd.f32 %v1728_v11, %v4618_v42  ;;  %v1642_v42 = vadd.f32 %v4738_v51, %v4732_v49 }
 0x181   : > { %v1862_v14 = vadd.f32 %v1842_v43, %v4723_v40 }
 0x186   : > { %v1950_v39 = vpop.f32.mrf.mxu2 }
 0x187   : > { %v2064_v13 = vpop.f32.mrf.mxu3  ;;  %v1730_v28 = vpop.f32.mrf.mxu0 }
 0x188   : > { %v1844_v20 = vpop.f32.mrf.mxu1  ;;  %v1749_v23 = vadd.f32 %v1730_v28, %v4630_v16  ;;  %v1970_v16 = vadd.f32 %v1950_v39, %v4728_v27  ;;  %v2084_v7 = vadd.f32 %v2064_v13, %v4730_v41  ;;  %v1636_v28 = vadd.f32 %v4756_v3, %v4660_v9 }
 0x189   : > { %v1863_v17 = vadd.f32 %v1844_v20, %v1435_v32  ;;  %v1439_v9 = vadd.f32 %v4770_v57, %v4681_v12  ;;  %v1646_v12 = vadd.f32 %v4778_v52, %v4772_v8 }
 0x18a   : > { %v3259_v22 = vpack.c.bf16 %v1749_v23, %v1748_v15 }
 0x18b   : > { %v3279_v6 = vpack.c.bf16 %v1863_v17, %v1862_v14 }
 0x18c   : > { %3260 = vst [vmem:[%s4803_s13] sm:$0xff] %v3259_v22  }
 0x18d   : > { %3341 = vst [vmem:[%s4803_s13 + $0x20] sm:$0xff] %v3279_v6  }
 0x18e   : > { %v1952_v40 = vpop.f32.mrf.mxu2 }
 0x18f   : > { %v2066_v59 = vpop.f32.mrf.mxu3  ;;  %v1971_v58 = vadd.f32 %v1952_v40, %v1634_v2  ;;  %v1733_v55 = vpop.f32.mrf.mxu0 }
 0x190   : > { %v2085_v60 = vadd.f32 %v2066_v59, %v1642_v42  ;;  %v1847_v61 = vpop.f32.mrf.mxu1  ;;  %v1750_v27 = vadd.f32 %v1733_v55, %v4646_v62 }
 0x191   : > { %v3299_v35 = vpack.c.bf16 %v1971_v58, %v1970_v16  ;;  %v1864_v41 = vadd.f32 %v1847_v61, %v4741_v46  ;;  %v1638_v16 = vadd.f32 %v4776_v24, %v4695_v45  ;;  %v1441_v45 = vadd.f32 %v4790_v29, %v4712_v54 }
 0x192   : > { %v3319_v47 = vpack.c.bf16 %v2085_v60, %v2084_v7  ;;  %v1648_v54 = vadd.f32 %v4796_v10, %v4792_v53 }
 0x193   : > { %3345 = vst [vmem:[%s4803_s13 + $0x40] sm:$0xff] %v3299_v35  }
 0x194   : > { %3349 = vst [vmem:[%s4803_s13 + $0x60] sm:$0xff] %v3319_v47  }
 0x196   : > { %v1955_v49 = vpop.f32.mrf.mxu2 }
 0x197   : > { %v2069_v50 = vpop.f32.mrf.mxu3  ;;  %v1735_v51 = vpop.f32.mrf.mxu0  ;;  %v1972_v62 = vadd.f32 %v1955_v49, %v4746_v63 }
 0x198   : > { %v1849_v11 = vpop.f32.mrf.mxu1  ;;  %v1751_v43 = vadd.f32 %v1735_v51, %v4658_v1  ;;  %v2086_v46 = vadd.f32 %v2069_v50, %v4748_v4 }
 0x199   : > { %v1865_v32 = vadd.f32 %v1849_v11, %v1437_v37  ;;  %v1640_v11 = vadd.f32 %v4794_v26, %v4720_v44  ;;  %v2188_v44 = vld [vmem:[%s4803_s13] sm:$0xff] (%p3550_p5)  }
 0x19a   : > { %v3264_v39 = vpack.c.bf16 %v1751_v43, %v1750_v27  ;;  %2189 = vst [vmem:[%s2171_s9] sm:$0xff] (%p3550_p5), %v2188_v44   ;;  %v2204_v26 = vld [vmem:[%s4803_s13 + $0x20] sm:$0xff] (%p3550_p5)  }
 0x19b   : > { %v3284_v13 = vpack.c.bf16 %v1865_v32, %v1864_v41  ;;  %2205 = vst [vmem:[%s2171_s9 + $0x80] sm:$0xff] (%p3550_p5), %v2204_v26  }
 0x19c   : > { %3338 = vst [vmem:[%s4803_s13 + $0x8] sm:$0xff] %v3264_v39  }
 0x19d   : > { %3342 = vst [vmem:[%s4803_s13 + $0x28] sm:$0xff] %v3284_v13  }
 0x19e   : > { %v1957_v36 = vpop.f32.mrf.mxu2 }
 0x19f   : > { %v2071_v20 = vpop.f32.mrf.mxu3  ;;  %v1973_v1 = vadd.f32 %v1957_v36, %v1636_v28  ;;  %v1738_v14 = vpop.f32.mrf.mxu0  ;;  %v2220_v28 = vld [vmem:[%s4803_s13 + $0x40] sm:$0xff] (%p3550_p5)  }
 0x1a0   : > { %v2087_v15 = vadd.f32 %v2071_v20, %v1644_v0  ;;  %v1852_v23 = vpop.f32.mrf.mxu1  ;;  %v1752_v63 = vadd.f32 %v1738_v14, %v4677_v19  ;;  %2221 = vst [vmem:[%s2171_s9 + $0x100] sm:$0xff] (%p3550_p5), %v2220_v28  }
 0x1a1   : > { %v3304_v17 = vpack.c.bf16 %v1973_v1, %v1972_v62  ;;  %v1866_v4 = vadd.f32 %v1852_v23, %v4761_v31  ;;  %v2236_v62 = vld [vmem:[%s4803_s13 + $0x60] sm:$0xff] (%p3550_p5)  }
 0x1a2   : > { %v3324_v22 = vpack.c.bf16 %v2087_v15, %v2086_v46  ;;  %2237 = vst [vmem:[%s2171_s9 + $0x180] sm:$0xff] (%p3550_p5), %v2236_v62  }
 0x1a3   : > { %3346 = vst [vmem:[%s4803_s13 + $0x48] sm:$0xff] %v3304_v17  }
 0x1a4   : > { %3350 = vst [vmem:[%s4803_s13 + $0x68] sm:$0xff] %v3324_v22   ;;  %v2208_v10 = vld [vmem:[%s4803_s13 + $0x28] sm:$0xff] (%p3550_p5)  }
 0x1a5   : > { %2209 = vst [vmem:[%s2171_s9 + $0x88] sm:$0xff] (%p3550_p5), %v2208_v10  }
 0x1a6   : > { %v1960_v25 = vpop.f32.mrf.mxu2 }
 0x1a7   : > { %v2074_v3 = vpop.f32.mrf.mxu3  ;;  %v1740_v38 = vpop.f32.mrf.mxu0  ;;  %v1974_v19 = vadd.f32 %v1960_v25, %v4766_v48 }
 0x1a8   : > { %v1854_v6 = vpop.f32.mrf.mxu1  ;;  %v1753_v2 = vadd.f32 %v1740_v38, %v4693_v30  ;;  %v2088_v31 = vadd.f32 %v2074_v3, %v4768_v56 }
 0x1a9   : > { %v1867_v42 = vadd.f32 %v1854_v6, %v1439_v9 }
 0x1aa   : > { %v3269_v40 = vpack.c.bf16 %v1753_v2, %v1752_v63  ;;  %v2224_v0 = vld [vmem:[%s4803_s13 + $0x48] sm:$0xff] (%p3550_p5)  }
 0x1ab   : > { %v3289_v59 = vpack.c.bf16 %v1867_v42, %v1866_v4  ;;  %2225 = vst [vmem:[%s2171_s9 + $0x108] sm:$0xff] (%p3550_p5), %v2224_v0   ;;  %v2240_v46 = vld [vmem:[%s4803_s13 + $0x68] sm:$0xff] (%p3550_p5)  }
 0x1ac   : > { %3339 = vst [vmem:[%s4803_s13 + $0x10] sm:$0xff] %v3269_v40  }
 0x1ad   : > { %3343 = vst [vmem:[%s4803_s13 + $0x30] sm:$0xff] %v3289_v59  }
 0x1ae   : > { %v1962_v57 = vpop.f32.mrf.mxu2  ;;  %2241 = vst [vmem:[%s2171_s9 + $0x188] sm:$0xff] (%p3550_p5), %v2240_v46  }
 0x1af   : > { %v2076_v7 = vpop.f32.mrf.mxu3  ;;  %v1975_v30 = vadd.f32 %v1962_v57, %v1638_v16  ;;  %v1743_v60 = vpop.f32.mrf.mxu0 }
 0x1b0   : > { %v2089_v58 = vadd.f32 %v2076_v7, %v1646_v12  ;;  %v1857_v55 = vpop.f32.mrf.mxu1  ;;  %v1754_v48 = vadd.f32 %v1743_v60, %v4708_v34 }
 0x1b1   : > { %v3309_v61 = vpack.c.bf16 %v1975_v30, %v1974_v19  ;;  %v1868_v56 = vadd.f32 %v1857_v55, %v4781_v33 }
 0x1b2   : > { %v3329_v35 = vpack.c.bf16 %v2089_v58, %v2088_v31 }
 0x1b3   : > { %3347 = vst [vmem:[%s4803_s13 + $0x50] sm:$0xff] %v3309_v61  }
 0x1b4   : > { %3351 = vst [vmem:[%s4803_s13 + $0x70] sm:$0xff] %v3329_v35   ;;  %v2212_v39 = vld [vmem:[%s4803_s13 + $0x30] sm:$0xff] (%p3550_p5)  }
 0x1b5   : > { %2213 = vst [vmem:[%s2171_s9 + $0x90] sm:$0xff] (%p3550_p5), %v2212_v39  }
 0x1b6   : > { %v1965_v8 = vpop.f32.mrf.mxu2 }
 0x1b7   : > { %v2079_v24 = vpop.f32.mrf.mxu3  ;;  %v1745_v52 = vpop.f32.mrf.mxu0  ;;  %v1976_v34 = vadd.f32 %v1965_v8, %v4786_v21  ;;  %v2192_v21 = vld [vmem:[%s4803_s13 + $0x8] sm:$0xff] (%p3550_p5)  }
 0x1b8   : > { %v1859_v47 = vpop.f32.mrf.mxu1  ;;  %v1755_v37 = vadd.f32 %v1745_v52, %v4718_v18  ;;  %v2090_v33 = vadd.f32 %v2079_v24, %v4788_v5  ;;  %v2196_v5 = vld [vmem:[%s4803_s13 + $0x10] sm:$0xff] (%p3550_p5)   ;;  %2193 = vst [vmem:[%s2171_s9 + $0x8] sm:$0xff] (%p3550_p5), %v2192_v21  }
 0x1b9   : > { %v1869_v49 = vadd.f32 %v1859_v47, %v1441_v45  ;;  %2197 = vst [vmem:[%s2171_s9 + $0x10] sm:$0xff] (%p3550_p5), %v2196_v5  }
 0x1ba   : > { %v3274_v50 = vpack.c.bf16 %v1755_v37, %v1754_v48  ;;  %v2228_v36 = vld [vmem:[%s4803_s13 + $0x50] sm:$0xff] (%p3550_p5)  }
 0x1bb   : > { %v3294_v51 = vpack.c.bf16 %v1869_v49, %v1868_v56  ;;  %2229 = vst [vmem:[%s2171_s9 + $0x110] sm:$0xff] (%p3550_p5), %v2228_v36   ;;  %v2244_v1 = vld [vmem:[%s4803_s13 + $0x70] sm:$0xff] (%p3550_p5)  }
 0x1bc   : > { %3340 = vst [vmem:[%s4803_s13 + $0x18] sm:$0xff] %v3274_v50  }
 0x1bd   : > { %3344 = vst [vmem:[%s4803_s13 + $0x38] sm:$0xff] %v3294_v51  }
 0x1be   : > { %v1967_v29 = vpop.f32.mrf.mxu2  ;;  %2245 = vst [vmem:[%s2171_s9 + $0x190] sm:$0xff] (%p3550_p5), %v2244_v1  }
 0x1bf   : > { %v2081_v27 = vpop.f32.mrf.mxu3  ;;  %v1977_v18 = vadd.f32 %v1967_v29, %v1640_v11 }
 0x1c0   : > { %v2091_v41 = vadd.f32 %v2081_v27, %v1648_v54  ;;  %2165 = sbr.rel (!%p3550_p5) target bundleno = 461 (0x1cd), region = 48 }
 0x1c1   : > { %v3314_v43 = vpack.c.bf16 %v1977_v18, %v1976_v34 }
 0x1c2   : > { %v3334_v32 = vpack.c.bf16 %v2091_v41, %v2090_v33 }
 0x1c3   : > { %3348 = vst [vmem:[%s4803_s13 + $0x58] sm:$0xff] %v3314_v43   ;;  %v2200_v53 = vld [vmem:[%s4803_s13 + $0x18] sm:$0xff] (%p3550_p5)  }
 0x1c4   : > { %3352 = vst [vmem:[%s4803_s13 + $0x78] sm:$0xff] %v3334_v32   ;;  %v2216_v13 = vld [vmem:[%s4803_s13 + $0x38] sm:$0xff] (%p3550_p5)  }
 0x1c5   : > { %2201 = vst [vmem:[%s2171_s9 + $0x18] sm:$0xff] %v2200_v53  }
 0x1c6   : > { %2217 = vst [vmem:[%s2171_s9 + $0x98] sm:$0xff] %v2216_v13  }
 0x1ca   : > { %v2232_v20 = vld [vmem:[%s4803_s13 + $0x58] sm:$0xff]  }
 0x1cb   : > { %2233 = vst [vmem:[%s2171_s9 + $0x118] sm:$0xff] %v2232_v20   ;;  %v2248_v15 = vld [vmem:[%s4803_s13 + $0x78] sm:$0xff]  }
 0x1cc   : > { %2249 = vst [vmem:[%s2171_s9 + $0x198] sm:$0xff] %v2248_v15  }
 0x1cd PF: > { %s16_s27 = sadd.s32 1, %s3467_s27   ;;  %s4921_s21 = smov %s3447_s22 }
 0x1ce   : > { %p13_p12 = scmp.ge.s32.totalorder %s16_s27, 10   ;;  %s4922_s22 = smov %s3561_s12 }
 0x1cf   : > { %s4923_s23 = smov %s3459_s25  ;;  %s4924_s24 = smov %s3463_s26 }
 0x1d0   : > { %s4925_s25 = smov %s4928_s28  ;;  %s4926_s26 = smov %s4932_s29 }
 0x1d1   :  { %15 = sbr.rel (!%p13_p12) target bundleno = 6 (0x6), region = 127 }

</bundles_post_ra>
